<compile_context>
chip_gen: v6e
topology: v6e:2x2x1
jax: 0.10.0
libtpu: 0.0.40
codegen_flags: <defaults>
</compile_context>

<pallas_src>
import functools
import math

import jax
import jax.numpy as jnp
from jax.experimental import pallas as pl
from jax.experimental.pallas import tpu as pltpu


# ---------------------------- config ----------------------------
class Config:
    hidden_size = 64
    num_attention_heads = 4
    num_key_value_heads = 2
    intermediate_size = 128
    max_position_embeddings = 64
    rope_pct = 1.0
    rope_theta = 10000.0
    norm_eps = 1e-6
    num_experts = 4
    moe_topk = 2
    num_null_experts = 1


# ---------------------------- kernel A: attention block ----------------------------
def _attn_block_kernel(hs_ref, lnw_ref, wqkv_ref, wo_ref, knw_ref, cos_ref, sin_ref,
                       o_ref, *, nh, kvh, hd, eps, scale):
    S = hs_ref.shape[1]
    n_rep = nh // kvh
    half = hd // 2

    x = hs_ref[0]                                                # (S, H) f32, residual
    # ---- input RMSNorm (f32) ----
    var = jnp.mean(x * x, axis=-1, keepdims=True)
    xn = x * jax.lax.rsqrt(var + eps) * lnw_ref[...]             # (S, H)

    # ---- fused QKV projection: one lane-dense (H, (nh+2*kvh)*hd) matmul ----
    qkv = jnp.dot(xn.astype(jnp.bfloat16), wqkv_ref[...],
                  preferred_element_type=jnp.float32)            # (S, 128)

    cos = cos_ref[0]                                             # (S, hd)
    sin = sin_ref[0]

    def rot_half(t):                                             # t: (S, hd)
        return jnp.concatenate([-t[:, half:], t[:, :half]], axis=-1)

    # causal mask built in-kernel (no mask input DMA)
    qpos = jax.lax.broadcasted_iota(jnp.int32, (S, S), 0)
    kpos = jax.lax.broadcasted_iota(jnp.int32, (S, S), 1)
    mask = jnp.where(kpos <= qpos, 0.0, -1e9).astype(jnp.float32)

    # ---- rotary + k_norm on the (shared) KV heads, kept in-register ----
    k_heads, v_heads = [], []
    for g in range(kvh):
        kg = qkv[:, (nh + g) * hd:(nh + g + 1) * hd]             # (S, hd)
        vg = qkv[:, (nh + kvh + g) * hd:(nh + kvh + g + 1) * hd]
        kg = kg * cos + rot_half(kg) * sin
        kvar = jnp.mean(kg * kg, axis=-1, keepdims=True)
        kg = kg * jax.lax.rsqrt(kvar + eps) * knw_ref[...]       # k_norm over head_dim
        k_heads.append(kg.astype(jnp.bfloat16))
        v_heads.append(vg.astype(jnp.bfloat16))

    # ---- per-query-head attention (unrolled; GQA via h // n_rep indexing) ----
    outs = []
    for h in range(nh):
        qh = qkv[:, h * hd:(h + 1) * hd]                         # (S, hd)
        qh = qh * cos + rot_half(qh) * sin
        kg = k_heads[h // n_rep]
        vg = v_heads[h // n_rep]
        s = jnp.dot(qh.astype(jnp.bfloat16), kg.T,
                    preferred_element_type=jnp.float32) * scale + mask   # (S, S)
        s = s - jnp.max(s, axis=-1, keepdims=True)
        p = jnp.exp(s)
        p = p * pl.reciprocal(jnp.sum(p, axis=-1, keepdims=True), approx=True)
        outs.append(jnp.dot(p.astype(jnp.bfloat16), vg,
                            preferred_element_type=jnp.float32))         # (S, hd)

    attn = jnp.concatenate(outs, axis=-1)                        # (S, nh*hd) == (S, H)
    attn = jnp.dot(attn.astype(jnp.bfloat16), wo_ref[...],
                   preferred_element_type=jnp.float32)           # (S, H)
    o_ref[0] = (x + attn).astype(o_ref.dtype)                    # fused residual add


# ---------------------------- kernel B: post-norm + router + MoE ----------------------------
def _moe_block_kernel(x_ref, lnw_ref, wg_ref, wgu_ref, wd_ref, o_ref, *,
                      E, NN, topk, inter, eps):
    x = x_ref[...]                                               # (TM, H) f32, residual
    # ---- post-attention RMSNorm (f32) ----
    var = jnp.mean(x * x, axis=-1, keepdims=True)
    xn = x * jax.lax.rsqrt(var + eps) * lnw_ref[...]             # (TM, H)

    # ---- router (f32; gate weight zero-padded to 128 lanes -> lane-dense) ----
    nslots = 2 * E + NN
    logits_p = jnp.dot(xn, wg_ref[...], preferred_element_type=jnp.float32)
    logits = logits_p[:, :nslots]                                # (TM, 2E+NN)
    col = jax.lax.broadcasted_iota(jnp.int32, logits.shape, 1)
    bias = jnp.where(col >= 2 * E, -10.0,
                     jnp.where(col >= E, -1.0, 0.0)).astype(jnp.float32)
    logits = logits + bias
    logits = logits - jnp.max(logits, axis=-1, keepdims=True)
    eg = jnp.exp(logits)
    gates = eg * pl.reciprocal(jnp.sum(eg, axis=-1, keepdims=True), approx=True)

    # ---- top-k selection mask via iterative max-masking (assumes no exact ties) ----
    sel = jnp.zeros(gates.shape, jnp.bool_)
    remaining = gates
    for _ in range(topk):
        m = jnp.max(remaining, axis=-1, keepdims=True)
        pick = remaining >= m
        sel = jnp.logical_or(sel, pick)
        remaining = jnp.where(pick, -jnp.inf, remaining)
    selm = sel.astype(jnp.float32)

    non_null = (col < 2 * E).astype(jnp.float32)
    wsum_nn = jnp.sum(gates * selm * non_null, axis=-1, keepdims=True)
    wsum_null = jnp.sum(gates * (1.0 - non_null), axis=-1, keepdims=True)
    gates_rn = gates * pl.reciprocal(wsum_nn + wsum_null, approx=True)
    slot_w = gates_rn * selm
    # +/- copies of expert j both contribute positively (matches reference);
    # null-expert slots contribute nothing.
    comb_w = slot_w[:, :E] + slot_w[:, E:2 * E]                  # (TM, E)

    # ---- experts: gate|up fused matmul, fully unrolled, in-register accumulate ----
    xb = xn.astype(jnp.bfloat16)
    acc = jnp.zeros_like(x)
    for e in range(E):
        gu = jnp.dot(xb, wgu_ref[e], preferred_element_type=jnp.float32)   # (TM, 2I)
        g = gu[:, :inter]
        u = gu[:, inter:]
        h = (g * jax.nn.sigmoid(g)) * u                                    # SiLU(gate)*up
        d = jnp.dot(h.astype(jnp.bfloat16), wd_ref[e],
                    preferred_element_type=jnp.float32)                    # (TM, H)
        acc = acc + d * comb_w[:, e:e + 1]
    o_ref[...] = (x + acc).astype(o_ref.dtype)                   # fused residual add


# ---------------------------- rotary cache (reference RotaryEmbedding) ----------------------------
def rotary_cache(rot_dim, max_pos, base):
    inv_freq = 1.0 / (base ** (jnp.arange(0, rot_dim, 2, dtype=jnp.float32) / rot_dim))
    t = jnp.arange(max_pos, dtype=jnp.float32)
    freqs = jnp.outer(t, inv_freq)
    emb = jnp.concatenate([freqs, freqs], axis=-1)
    return jnp.cos(emb), jnp.sin(emb)


# ---------------------------- params ----------------------------
def init_params(cfg, key):
    H = cfg.hidden_size
    nh, kvh = cfg.num_attention_heads, cfg.num_key_value_heads
    hd = H // nh
    I = cfg.intermediate_size
    E, NN = cfg.num_experts, cfg.num_null_experts
    keys = jax.random.split(key, 8)

    def lin(k, shape):
        return jax.random.normal(k, shape, jnp.float32) * 0.02

    wq = lin(keys[0], (H, nh * hd))
    wk = lin(keys[1], (H, kvh * hd))
    wv = lin(keys[2], (H, kvh * hd))
    wo = lin(keys[3], (H, H))
    w_gate = lin(keys[4], (H, 2 * E + NN))
    e_gate = lin(keys[5], (E, H, I))
    e_up = lin(keys[6], (E, H, I))
    e_down = lin(keys[7], (E, I, H))

    gate_pad = ((2 * E + NN + 127) // 128) * 128
    w_gate_p = jnp.zeros((H, gate_pad), jnp.float32).at[:, :2 * E + NN].set(w_gate)

    return dict(
        # fused QKV -> one lane-dense (H, 128) bf16 matmul weight
        wqkv=jnp.concatenate([wq, wk, wv], axis=1).astype(jnp.bfloat16),
        wo=wo.astype(jnp.bfloat16),
        k_norm_w=jnp.ones((hd,), jnp.float32),
        ln_in_w=jnp.ones((H,), jnp.float32),
        ln_post_w=jnp.ones((H,), jnp.float32),
        w_gate_p=w_gate_p,                                            # router stays f32
        e_gu=jnp.concatenate([e_gate, e_up], axis=2).astype(jnp.bfloat16),   # (E,H,2I)
        e_down=e_down.astype(jnp.bfloat16),                                  # (E,I,H)
    )


# ---------------------------- layer forward ----------------------------
def tcmoe_decoder_layer(params, cfg, hidden_states, position_ids):
    B, S, H = hidden_states.shape
    nh, kvh = cfg.num_attention_heads, cfg.num_key_value_heads
    hd = H // nh
    rot = int(hd * cfg.rope_pct)
    assert rot == hd, "rope_pct must be 1.0 (k_norm broadcast, see header)"
    I = cfg.intermediate_size
    E, NN, topk = cfg.num_experts, cfg.num_null_experts, cfg.moe_topk

    # rotary cos/sin cache (constant buffer, as in the reference module), gathered
    # by position_ids once outside the kernel (tiny).
    cos_c, sin_c = rotary_cache(rot, cfg.max_position_embeddings, cfg.rope_theta)
    cos = cos_c[position_ids]            # (B, S, rot)
    sin = sin_c[position_ids]

    # ---- kernel A: norm + QKV + rotary + k_norm + attention + Wo + residual ----
    attn_out = pl.pallas_call(
        functools.partial(_attn_block_kernel, nh=nh, kvh=kvh, hd=hd,
                          eps=cfg.norm_eps, scale=1.0 / math.sqrt(hd)),
        out_shape=jax.ShapeDtypeStruct((B, S, H), jnp.float32),
        grid=(B,),
        in_specs=[
            pl.BlockSpec((1, S, H), lambda b: (b, 0, 0)),
            pl.BlockSpec((1, H), lambda b: (0, 0)),
            pl.BlockSpec((H, (nh + 2 * kvh) * hd), lambda b: (0, 0)),
            pl.BlockSpec((H, H), lambda b: (0, 0)),
            pl.BlockSpec((1, rot), lambda b: (0, 0)),
            pl.BlockSpec((1, S, rot), lambda b: (b, 0, 0)),
            pl.BlockSpec((1, S, rot), lambda b: (b, 0, 0)),
        ],
        out_specs=pl.BlockSpec((1, S, H), lambda b: (b, 0, 0)),
        compiler_params=pltpu.CompilerParams(dimension_semantics=("parallel",)),
    )(hidden_states, params["ln_in_w"].reshape(1, H), params["wqkv"], params["wo"],
      params["k_norm_w"].reshape(1, rot), cos, sin)

    # ---- kernel B: post-norm + router + experts + residual ----
    T = B * S
    TM = min(8, T)
    hs2d = attn_out.reshape(T, H)
    moe_out = pl.pallas_call(
        functools.partial(_moe_block_kernel, E=E, NN=NN, topk=topk,
                          inter=I, eps=cfg.norm_eps),
        out_shape=jax.ShapeDtypeStruct((T, H), jnp.float32),
        grid=(T // TM,),
        in_specs=[
            pl.BlockSpec((TM, H), lambda i: (i, 0)),
            pl.BlockSpec((1, H), lambda i: (0, 0)),
            pl.BlockSpec(params["w_gate_p"].shape, lambda i: (0, 0)),
            pl.BlockSpec(params["e_gu"].shape, lambda i: (0, 0, 0)),
            pl.BlockSpec(params["e_down"].shape, lambda i: (0, 0, 0)),
        ],
        out_specs=pl.BlockSpec((TM, H), lambda i: (i, 0)),
        compiler_params=pltpu.CompilerParams(dimension_semantics=("parallel",)),
    )(hs2d, params["ln_post_w"].reshape(1, H), params["w_gate_p"],
      params["e_gu"], params["e_down"])

    return moe_out.reshape(B, S, H)


# ---------------------------- main ----------------------------
if __name__ == "__main__":
    cfg = Config()
    key = jax.random.PRNGKey(0)
    kp, kx = jax.random.split(key)
    params = init_params(cfg, kp)

    B, S, H = 2, 8, cfg.hidden_size
    x = jax.random.normal(kx, (B, S, H), jnp.float32)
    position_ids = jnp.broadcast_to(jnp.arange(S), (B, S))

    fwd = jax.jit(lambda h, p: tcmoe_decoder_layer(params, cfg, h, p))
    out = fwd(x, position_ids)
    jax.block_until_ready(out)
    assert out.shape == (B, S, H)
    assert bool(jnp.all(jnp.isfinite(out)))
    print("KERNEL_OK")
</pallas_src>

<mosaic_0001>
module attributes {stable_mosaic.version = 11 : i64} {
  func.func @_moe_block_kernel(%arg0: i32, %arg1: memref<8x64xf32, #tpu.memory_space<vmem>>, %arg2: memref<1x64xf32, #tpu.memory_space<vmem>>, %arg3: memref<64x128xf32, #tpu.memory_space<vmem>>, %arg4: memref<4x64x256xbf16, #tpu.memory_space<vmem>>, %arg5: memref<4x128x64xbf16, #tpu.memory_space<vmem>>, %arg6: memref<8x64xf32, #tpu.memory_space<vmem>>) attributes {dimension_semantics = [#tpu.dimension_semantics<parallel>], iteration_bounds = array<i64: 2>, scalar_prefetch = 0 : i64, scratch_operands = 0 : i64, tpu.core_type = #tpu.core_type<tc>, window_params = [{transform_indices = @transform_0, window_bounds = array<i64: 8, 64>}, {pipeline_mode = #tpu.pipeline_mode<synchronous>, transform_indices = @transform_1, window_bounds = array<i64: 1, 64>}, {pipeline_mode = #tpu.pipeline_mode<synchronous>, transform_indices = @transform_2, window_bounds = array<i64: 64, 128>}, {pipeline_mode = #tpu.pipeline_mode<synchronous>, transform_indices = @transform_3, window_bounds = array<i64: 4, 64, 256>}, {pipeline_mode = #tpu.pipeline_mode<synchronous>, transform_indices = @transform_4, window_bounds = array<i64: 4, 128, 64>}, {transform_indices = @transform_5, window_bounds = array<i64: 8, 64>}]} {
    %c0 = arith.constant 0 : index
    %c0_0 = arith.constant 0 : index
    %0 = vector.load %arg1[%c0, %c0_0] : memref<8x64xf32, #tpu.memory_space<vmem>>, vector<8x64xf32>
    %1 = arith.mulf %0, %0 : vector<8x64xf32>
    %cst = arith.constant dense<0.000000e+00> : vector<8xf32>
    %2 = vector.multi_reduction <add>, %1, %cst [1] : vector<8x64xf32> to vector<8xf32>
    %3 = vector.shape_cast %2 : vector<8xf32> to vector<8x1xf32>
    %cst_1 = arith.constant 6.400000e+01 : f32
    %4 = vector.broadcast %cst_1 : f32 to vector<8x1xf32>
    %5 = arith.divf %3, %4 : vector<8x1xf32>
    %cst_2 = arith.constant 9.99999997E-7 : f32
    %6 = vector.broadcast %cst_2 : f32 to vector<8x1xf32>
    %7 = arith.addf %5, %6 : vector<8x1xf32>
    %8 = math.rsqrt %7 : vector<8x1xf32>
    %9 = vector.broadcast %8 : vector<8x1xf32> to vector<8x64xf32>
    %10 = arith.mulf %0, %9 : vector<8x64xf32>
    %c0_3 = arith.constant 0 : index
    %c0_4 = arith.constant 0 : index
    %11 = vector.load %arg2[%c0_3, %c0_4] : memref<1x64xf32, #tpu.memory_space<vmem>>, vector<1x64xf32>
    %12 = vector.broadcast %11 : vector<1x64xf32> to vector<8x64xf32>
    %13 = arith.mulf %10, %12 : vector<8x64xf32>
    %c0_5 = arith.constant 0 : index
    %c0_6 = arith.constant 0 : index
    %14 = vector.load %arg3[%c0_5, %c0_6] : memref<64x128xf32, #tpu.memory_space<vmem>>, vector<64x128xf32>
    %cst_7 = arith.constant dense<0.000000e+00> : vector<8x128xf32>
    %15 = tpu.matmul %13, %14, %cst_7 {dimension_numbers = #tpu.dot_dimension_numbers<[1], [0], [0], [1], [0, 0, 1, 1], [], []>} : vector<8x64xf32>, vector<64x128xf32>, vector<8x128xf32> -> vector<8x128xf32>
    %16 = vector.extract_strided_slice %15 {offsets = [0, 0], sizes = [8, 9], strides = [1, 1]} : vector<8x128xf32> to vector<8x9xf32>
    %17 = tpu.iota {dimensions = array<i32: 1>} : vector<8x9xi32>
    %c8_i32 = arith.constant 8 : i32
    %18 = vector.broadcast %c8_i32 : i32 to vector<8x9xi32>
    %19 = arith.cmpi sge, %17, %18 : vector<8x9xi32>
    %c4_i32 = arith.constant 4 : i32
    %20 = vector.broadcast %c4_i32 : i32 to vector<8x9xi32>
    %21 = arith.cmpi sge, %17, %20 : vector<8x9xi32>
    %cst_8 = arith.constant -1.000000e+00 : f32
    %cst_9 = arith.constant 0.000000e+00 : f32
    %22 = vector.broadcast %cst_8 : f32 to vector<8x9xf32>
    %23 = vector.broadcast %cst_9 : f32 to vector<8x9xf32>
    %24 = arith.select %21, %22, %23 : vector<8x9xi1>, vector<8x9xf32>
    %cst_10 = arith.constant -1.000000e+01 : f32
    %25 = vector.broadcast %cst_10 : f32 to vector<8x9xf32>
    %26 = arith.select %19, %25, %24 : vector<8x9xi1>, vector<8x9xf32>
    %27 = arith.addf %16, %26 : vector<8x9xf32>
    %cst_11 = arith.constant dense<0xFF800000> : vector<8xf32>
    %28 = vector.multi_reduction <maximumf>, %27, %cst_11 [1] : vector<8x9xf32> to vector<8xf32>
    %29 = vector.shape_cast %28 : vector<8xf32> to vector<8x1xf32>
    %30 = vector.broadcast %29 : vector<8x1xf32> to vector<8x9xf32>
    %31 = arith.subf %27, %30 : vector<8x9xf32>
    %32 = math.exp %31 : vector<8x9xf32>
    %cst_12 = arith.constant dense<0.000000e+00> : vector<8xf32>
    %33 = vector.multi_reduction <add>, %32, %cst_12 [1] : vector<8x9xf32> to vector<8xf32>
    %34 = vector.shape_cast %33 : vector<8xf32> to vector<8x1xf32>
    %35 = tpu.reciprocal %34 {approx = true} : vector<8x1xf32> -> vector<8x1xf32>
    %36 = vector.broadcast %35 : vector<8x1xf32> to vector<8x9xf32>
    %37 = arith.mulf %32, %36 : vector<8x9xf32>
    %false = arith.constant false
    %38 = vector.broadcast %false : i1 to vector<8x9xi1>
    %cst_13 = arith.constant dense<0xFF800000> : vector<8xf32>
    %39 = vector.multi_reduction <maximumf>, %37, %cst_13 [1] : vector<8x9xf32> to vector<8xf32>
    %40 = vector.shape_cast %39 : vector<8xf32> to vector<8x1xf32>
    %41 = vector.broadcast %40 : vector<8x1xf32> to vector<8x9xf32>
    %42 = arith.cmpf oge, %37, %41 : vector<8x9xf32>
    %43 = arith.ori %38, %42 : vector<8x9xi1>
    %cst_14 = arith.constant 0xFF800000 : f32
    %44 = vector.broadcast %cst_14 : f32 to vector<8x9xf32>
    %45 = arith.select %42, %44, %37 : vector<8x9xi1>, vector<8x9xf32>
    %cst_15 = arith.constant dense<0xFF800000> : vector<8xf32>
    %46 = vector.multi_reduction <maximumf>, %45, %cst_15 [1] : vector<8x9xf32> to vector<8xf32>
    %47 = vector.shape_cast %46 : vector<8xf32> to vector<8x1xf32>
    %48 = vector.broadcast %47 : vector<8x1xf32> to vector<8x9xf32>
    %49 = arith.cmpf oge, %45, %48 : vector<8x9xf32>
    %50 = arith.ori %43, %49 : vector<8x9xi1>
    %51 = arith.extui %50 : vector<8x9xi1> to vector<8x9xi32>
    %52 = arith.sitofp %51 : vector<8x9xi32> to vector<8x9xf32>
    %c8_i32_16 = arith.constant 8 : i32
    %53 = vector.broadcast %c8_i32_16 : i32 to vector<8x9xi32>
    %54 = arith.cmpi slt, %17, %53 : vector<8x9xi32>
    %55 = arith.extui %54 : vector<8x9xi1> to vector<8x9xi32>
    %56 = arith.sitofp %55 : vector<8x9xi32> to vector<8x9xf32>
    %57 = arith.mulf %37, %52 : vector<8x9xf32>
    %58 = arith.mulf %57, %56 : vector<8x9xf32>
    %cst_17 = arith.constant dense<0.000000e+00> : vector<8xf32>
    %59 = vector.multi_reduction <add>, %58, %cst_17 [1] : vector<8x9xf32> to vector<8xf32>
    %60 = vector.shape_cast %59 : vector<8xf32> to vector<8x1xf32>
    %cst_18 = arith.constant 1.000000e+00 : f32
    %61 = vector.broadcast %cst_18 : f32 to vector<8x9xf32>
    %62 = arith.subf %61, %56 : vector<8x9xf32>
    %63 = arith.mulf %37, %62 : vector<8x9xf32>
    %cst_19 = arith.constant dense<0.000000e+00> : vector<8xf32>
    %64 = vector.multi_reduction <add>, %63, %cst_19 [1] : vector<8x9xf32> to vector<8xf32>
    %65 = vector.shape_cast %64 : vector<8xf32> to vector<8x1xf32>
    %66 = arith.addf %60, %65 : vector<8x1xf32>
    %67 = tpu.reciprocal %66 {approx = true} : vector<8x1xf32> -> vector<8x1xf32>
    %68 = vector.broadcast %67 : vector<8x1xf32> to vector<8x9xf32>
    %69 = arith.mulf %37, %68 : vector<8x9xf32>
    %70 = arith.mulf %69, %52 : vector<8x9xf32>
    %71 = vector.extract_strided_slice %70 {offsets = [0, 0], sizes = [8, 4], strides = [1, 1]} : vector<8x9xf32> to vector<8x4xf32>
    %72 = vector.extract_strided_slice %70 {offsets = [0, 4], sizes = [8, 4], strides = [1, 1]} : vector<8x9xf32> to vector<8x4xf32>
    %73 = arith.addf %71, %72 : vector<8x4xf32>
    %74 = arith.truncf %13 : vector<8x64xf32> to vector<8x64xbf16>
    %cst_20 = arith.constant 0.000000e+00 : f32
    %75 = vector.broadcast %cst_20 : f32 to vector<8x64xf32>
    %c0_21 = arith.constant 0 : index
    %c0_22 = arith.constant 0 : index
    %c0_23 = arith.constant 0 : index
    %76 = vector.load %arg4[%c0_21, %c0_22, %c0_23] : memref<4x64x256xbf16, #tpu.memory_space<vmem>>, vector<1x64x256xbf16>
    %77 = vector.shape_cast %76 : vector<1x64x256xbf16> to vector<64x256xbf16>
    %cst_24 = arith.constant dense<0.000000e+00> : vector<8x256xf32>
    %78 = tpu.matmul %74, %77, %cst_24 {dimension_numbers = #tpu.dot_dimension_numbers<[1], [0], [0], [1], [0, 0, 1, 1], [], []>} : vector<8x64xbf16>, vector<64x256xbf16>, vector<8x256xf32> -> vector<8x256xf32>
    %79 = vector.extract_strided_slice %78 {offsets = [0, 0], sizes = [8, 128], strides = [1, 1]} : vector<8x256xf32> to vector<8x128xf32>
    %80 = vector.extract_strided_slice %78 {offsets = [0, 128], sizes = [8, 128], strides = [1, 1]} : vector<8x256xf32> to vector<8x128xf32>
    %81 = arith.negf %79 : vector<8x128xf32>
    %82 = math.exp %81 : vector<8x128xf32>
    %cst_25 = arith.constant 1.000000e+00 : f32
    %83 = vector.broadcast %cst_25 : f32 to vector<8x128xf32>
    %84 = arith.addf %83, %82 : vector<8x128xf32>
    %85 = arith.divf %83, %84 : vector<8x128xf32>
    %86 = arith.mulf %79, %85 : vector<8x128xf32>
    %87 = arith.mulf %86, %80 : vector<8x128xf32>
    %88 = arith.truncf %87 : vector<8x128xf32> to vector<8x128xbf16>
    %c0_26 = arith.constant 0 : index
    %c0_27 = arith.constant 0 : index
    %c0_28 = arith.constant 0 : index
    %89 = vector.load %arg5[%c0_26, %c0_27, %c0_28] : memref<4x128x64xbf16, #tpu.memory_space<vmem>>, vector<1x128x64xbf16>
    %90 = vector.shape_cast %89 : vector<1x128x64xbf16> to vector<128x64xbf16>
    %cst_29 = arith.constant dense<0.000000e+00> : vector<8x64xf32>
    %91 = tpu.matmul %88, %90, %cst_29 {dimension_numbers = #tpu.dot_dimension_numbers<[1], [0], [0], [1], [0, 0, 1, 1], [], []>} : vector<8x128xbf16>, vector<128x64xbf16>, vector<8x64xf32> -> vector<8x64xf32>
    %92 = vector.extract_strided_slice %73 {offsets = [0, 0], sizes = [8, 1], strides = [1, 1]} : vector<8x4xf32> to vector<8x1xf32>
    %93 = vector.broadcast %92 : vector<8x1xf32> to vector<8x64xf32>
    %94 = arith.mulf %91, %93 : vector<8x64xf32>
    %95 = arith.addf %75, %94 : vector<8x64xf32>
    %c1 = arith.constant 1 : index
    %c0_30 = arith.constant 0 : index
    %c0_31 = arith.constant 0 : index
    %96 = vector.load %arg4[%c1, %c0_30, %c0_31] : memref<4x64x256xbf16, #tpu.memory_space<vmem>>, vector<1x64x256xbf16>
    %97 = vector.shape_cast %96 : vector<1x64x256xbf16> to vector<64x256xbf16>
    %cst_32 = arith.constant dense<0.000000e+00> : vector<8x256xf32>
    %98 = tpu.matmul %74, %97, %cst_32 {dimension_numbers = #tpu.dot_dimension_numbers<[1], [0], [0], [1], [0, 0, 1, 1], [], []>} : vector<8x64xbf16>, vector<64x256xbf16>, vector<8x256xf32> -> vector<8x256xf32>
    %99 = vector.extract_strided_slice %98 {offsets = [0, 0], sizes = [8, 128], strides = [1, 1]} : vector<8x256xf32> to vector<8x128xf32>
    %100 = vector.extract_strided_slice %98 {offsets = [0, 128], sizes = [8, 128], strides = [1, 1]} : vector<8x256xf32> to vector<8x128xf32>
    %101 = arith.negf %99 : vector<8x128xf32>
    %102 = math.exp %101 : vector<8x128xf32>
    %cst_33 = arith.constant 1.000000e+00 : f32
    %103 = vector.broadcast %cst_33 : f32 to vector<8x128xf32>
    %104 = arith.addf %103, %102 : vector<8x128xf32>
    %105 = arith.divf %103, %104 : vector<8x128xf32>
    %106 = arith.mulf %99, %105 : vector<8x128xf32>
    %107 = arith.mulf %106, %100 : vector<8x128xf32>
    %108 = arith.truncf %107 : vector<8x128xf32> to vector<8x128xbf16>
    %c1_34 = arith.constant 1 : index
    %c0_35 = arith.constant 0 : index
    %c0_36 = arith.constant 0 : index
    %109 = vector.load %arg5[%c1_34, %c0_35, %c0_36] : memref<4x128x64xbf16, #tpu.memory_space<vmem>>, vector<1x128x64xbf16>
    %110 = vector.shape_cast %109 : vector<1x128x64xbf16> to vector<128x64xbf16>
    %cst_37 = arith.constant dense<0.000000e+00> : vector<8x64xf32>
    %111 = tpu.matmul %108, %110, %cst_37 {dimension_numbers = #tpu.dot_dimension_numbers<[1], [0], [0], [1], [0, 0, 1, 1], [], []>} : vector<8x128xbf16>, vector<128x64xbf16>, vector<8x64xf32> -> vector<8x64xf32>
    %112 = vector.extract_strided_slice %73 {offsets = [0, 1], sizes = [8, 1], strides = [1, 1]} : vector<8x4xf32> to vector<8x1xf32>
    %113 = vector.broadcast %112 : vector<8x1xf32> to vector<8x64xf32>
    %114 = arith.mulf %111, %113 : vector<8x64xf32>
    %115 = arith.addf %95, %114 : vector<8x64xf32>
    %c2 = arith.constant 2 : index
    %c0_38 = arith.constant 0 : index
    %c0_39 = arith.constant 0 : index
    %116 = vector.load %arg4[%c2, %c0_38, %c0_39] : memref<4x64x256xbf16, #tpu.memory_space<vmem>>, vector<1x64x256xbf16>
    %117 = vector.shape_cast %116 : vector<1x64x256xbf16> to vector<64x256xbf16>
    %cst_40 = arith.constant dense<0.000000e+00> : vector<8x256xf32>
    %118 = tpu.matmul %74, %117, %cst_40 {dimension_numbers = #tpu.dot_dimension_numbers<[1], [0], [0], [1], [0, 0, 1, 1], [], []>} : vector<8x64xbf16>, vector<64x256xbf16>, vector<8x256xf32> -> vector<8x256xf32>
    %119 = vector.extract_strided_slice %118 {offsets = [0, 0], sizes = [8, 128], strides = [1, 1]} : vector<8x256xf32> to vector<8x128xf32>
    %120 = vector.extract_strided_slice %118 {offsets = [0, 128], sizes = [8, 128], strides = [1, 1]} : vector<8x256xf32> to vector<8x128xf32>
    %121 = arith.negf %119 : vector<8x128xf32>
    %122 = math.exp %121 : vector<8x128xf32>
    %cst_41 = arith.constant 1.000000e+00 : f32
    %123 = vector.broadcast %cst_41 : f32 to vector<8x128xf32>
    %124 = arith.addf %123, %122 : vector<8x128xf32>
    %125 = arith.divf %123, %124 : vector<8x128xf32>
    %126 = arith.mulf %119, %125 : vector<8x128xf32>
    %127 = arith.mulf %126, %120 : vector<8x128xf32>
    %128 = arith.truncf %127 : vector<8x128xf32> to vector<8x128xbf16>
    %c2_42 = arith.constant 2 : index
    %c0_43 = arith.constant 0 : index
    %c0_44 = arith.constant 0 : index
    %129 = vector.load %arg5[%c2_42, %c0_43, %c0_44] : memref<4x128x64xbf16, #tpu.memory_space<vmem>>, vector<1x128x64xbf16>
    %130 = vector.shape_cast %129 : vector<1x128x64xbf16> to vector<128x64xbf16>
    %cst_45 = arith.constant dense<0.000000e+00> : vector<8x64xf32>
    %131 = tpu.matmul %128, %130, %cst_45 {dimension_numbers = #tpu.dot_dimension_numbers<[1], [0], [0], [1], [0, 0, 1, 1], [], []>} : vector<8x128xbf16>, vector<128x64xbf16>, vector<8x64xf32> -> vector<8x64xf32>
    %132 = vector.extract_strided_slice %73 {offsets = [0, 2], sizes = [8, 1], strides = [1, 1]} : vector<8x4xf32> to vector<8x1xf32>
    %133 = vector.broadcast %132 : vector<8x1xf32> to vector<8x64xf32>
    %134 = arith.mulf %131, %133 : vector<8x64xf32>
    %135 = arith.addf %115, %134 : vector<8x64xf32>
    %c3 = arith.constant 3 : index
    %c0_46 = arith.constant 0 : index
    %c0_47 = arith.constant 0 : index
    %136 = vector.load %arg4[%c3, %c0_46, %c0_47] : memref<4x64x256xbf16, #tpu.memory_space<vmem>>, vector<1x64x256xbf16>
    %137 = vector.shape_cast %136 : vector<1x64x256xbf16> to vector<64x256xbf16>
    %cst_48 = arith.constant dense<0.000000e+00> : vector<8x256xf32>
    %138 = tpu.matmul %74, %137, %cst_48 {dimension_numbers = #tpu.dot_dimension_numbers<[1], [0], [0], [1], [0, 0, 1, 1], [], []>} : vector<8x64xbf16>, vector<64x256xbf16>, vector<8x256xf32> -> vector<8x256xf32>
    %139 = vector.extract_strided_slice %138 {offsets = [0, 0], sizes = [8, 128], strides = [1, 1]} : vector<8x256xf32> to vector<8x128xf32>
    %140 = vector.extract_strided_slice %138 {offsets = [0, 128], sizes = [8, 128], strides = [1, 1]} : vector<8x256xf32> to vector<8x128xf32>
    %141 = arith.negf %139 : vector<8x128xf32>
    %142 = math.exp %141 : vector<8x128xf32>
    %cst_49 = arith.constant 1.000000e+00 : f32
    %143 = vector.broadcast %cst_49 : f32 to vector<8x128xf32>
    %144 = arith.addf %143, %142 : vector<8x128xf32>
    %145 = arith.divf %143, %144 : vector<8x128xf32>
    %146 = arith.mulf %139, %145 : vector<8x128xf32>
    %147 = arith.mulf %146, %140 : vector<8x128xf32>
    %148 = arith.truncf %147 : vector<8x128xf32> to vector<8x128xbf16>
    %c3_50 = arith.constant 3 : index
    %c0_51 = arith.constant 0 : index
    %c0_52 = arith.constant 0 : index
    %149 = vector.load %arg5[%c3_50, %c0_51, %c0_52] : memref<4x128x64xbf16, #tpu.memory_space<vmem>>, vector<1x128x64xbf16>
    %150 = vector.shape_cast %149 : vector<1x128x64xbf16> to vector<128x64xbf16>
    %cst_53 = arith.constant dense<0.000000e+00> : vector<8x64xf32>
    %151 = tpu.matmul %148, %150, %cst_53 {dimension_numbers = #tpu.dot_dimension_numbers<[1], [0], [0], [1], [0, 0, 1, 1], [], []>} : vector<8x128xbf16>, vector<128x64xbf16>, vector<8x64xf32> -> vector<8x64xf32>
    %152 = vector.extract_strided_slice %73 {offsets = [0, 3], sizes = [8, 1], strides = [1, 1]} : vector<8x4xf32> to vector<8x1xf32>
    %153 = vector.broadcast %152 : vector<8x1xf32> to vector<8x64xf32>
    %154 = arith.mulf %151, %153 : vector<8x64xf32>
    %155 = arith.addf %135, %154 : vector<8x64xf32>
    %156 = arith.addf %0, %155 : vector<8x64xf32>
    %c0_54 = arith.constant 0 : index
    %c0_55 = arith.constant 0 : index
    %157 = vector.load %arg6[%c0_54, %c0_55] : memref<8x64xf32, #tpu.memory_space<vmem>>, vector<8x64xf32>
    tpu.vector_store %arg6[%c0_54, %c0_55], %156 {strides = array<i32>} : memref<8x64xf32, #tpu.memory_space<vmem>>, vector<8x64xf32>,
    return
  }
  func.func @transform_0(%arg0: i32) -> (i32, i32) {
    %c0_i32 = arith.constant 0 : i32
    %c0_i32_0 = arith.constant 0 : i32
    return %arg0, %c0_i32 : i32, i32
  }
  func.func @transform_1(%arg0: i32) -> (i32, i32) {
    %c0_i32 = arith.constant 0 : i32
    %c0_i32_0 = arith.constant 0 : i32
    %c0_i32_1 = arith.constant 0 : i32
    return %c0_i32, %c0_i32_0 : i32, i32
  }
  func.func @transform_2(%arg0: i32) -> (i32, i32) {
    %c0_i32 = arith.constant 0 : i32
    %c0_i32_0 = arith.constant 0 : i32
    %c0_i32_1 = arith.constant 0 : i32
    return %c0_i32, %c0_i32_0 : i32, i32
  }
  func.func @transform_3(%arg0: i32) -> (i32, i32, i32) {
    %c0_i32 = arith.constant 0 : i32
    %c0_i32_0 = arith.constant 0 : i32
    %c0_i32_1 = arith.constant 0 : i32
    %c0_i32_2 = arith.constant 0 : i32
    return %c0_i32, %c0_i32_0, %c0_i32_1 : i32, i32, i32
  }
  func.func @transform_4(%arg0: i32) -> (i32, i32, i32) {
    %c0_i32 = arith.constant 0 : i32
    %c0_i32_0 = arith.constant 0 : i32
    %c0_i32_1 = arith.constant 0 : i32
    %c0_i32_2 = arith.constant 0 : i32
    return %c0_i32, %c0_i32_0, %c0_i32_1 : i32, i32, i32
  }
  func.func @transform_5(%arg0: i32) -> (i32, i32) {
    %c0_i32 = arith.constant 0 : i32
    %c0_i32_0 = arith.constant 0 : i32
    return %arg0, %c0_i32 : i32, i32
  }
}

module attributes {stable_mosaic.version = 11 : i64} {
  func.func @_attn_block_kernel(%arg0: i32, %arg1: memref<1x8x64xf32, #tpu.memory_space<vmem>>, %arg2: memref<1x64xf32, #tpu.memory_space<vmem>>, %arg3: memref<64x128xbf16, #tpu.memory_space<vmem>>, %arg4: memref<64x64xbf16, #tpu.memory_space<vmem>>, %arg5: memref<1x16xf32, #tpu.memory_space<vmem>>, %arg6: memref<1x8x16xf32, #tpu.memory_space<vmem>>, %arg7: memref<1x8x16xf32, #tpu.memory_space<vmem>>, %arg8: memref<1x8x64xf32, #tpu.memory_space<vmem>>) attributes {dimension_semantics = [#tpu.dimension_semantics<parallel>], iteration_bounds = array<i64: 2>, scalar_prefetch = 0 : i64, scratch_operands = 0 : i64, tpu.core_type = #tpu.core_type<tc>, window_params = [{transform_indices = @transform_0, window_bounds = array<i64: 1, 8, 64>}, {pipeline_mode = #tpu.pipeline_mode<synchronous>, transform_indices = @transform_1, window_bounds = array<i64: 1, 64>}, {pipeline_mode = #tpu.pipeline_mode<synchronous>, transform_indices = @transform_2, window_bounds = array<i64: 64, 128>}, {pipeline_mode = #tpu.pipeline_mode<synchronous>, transform_indices = @transform_3, window_bounds = array<i64: 64, 64>}, {pipeline_mode = #tpu.pipeline_mode<synchronous>, transform_indices = @transform_4, window_bounds = array<i64: 1, 16>}, {transform_indices = @transform_5, window_bounds = array<i64: 1, 8, 16>}, {transform_indices = @transform_6, window_bounds = array<i64: 1, 8, 16>}, {transform_indices = @transform_7, window_bounds = array<i64: 1, 8, 64>}]} {
    %c0 = arith.constant 0 : index
    %c0_0 = arith.constant 0 : index
    %c0_1 = arith.constant 0 : index
    %0 = vector.load %arg1[%c0, %c0_0, %c0_1] : memref<1x8x64xf32, #tpu.memory_space<vmem>>, vector<1x8x64xf32>
    %1 = vector.shape_cast %0 : vector<1x8x64xf32> to vector<8x64xf32>
    %2 = arith.mulf %1, %1 : vector<8x64xf32>
    %cst = arith.constant dense<0.000000e+00> : vector<8xf32>
    %3 = vector.multi_reduction <add>, %2, %cst [1] : vector<8x64xf32> to vector<8xf32>
    %4 = vector.shape_cast %3 : vector<8xf32> to vector<8x1xf32>
    %cst_2 = arith.constant 6.400000e+01 : f32
    %5 = vector.broadcast %cst_2 : f32 to vector<8x1xf32>
    %6 = arith.divf %4, %5 : vector<8x1xf32>
    %cst_3 = arith.constant 9.99999997E-7 : f32
    %7 = vector.broadcast %cst_3 : f32 to vector<8x1xf32>
    %8 = arith.addf %6, %7 : vector<8x1xf32>
    %9 = math.rsqrt %8 : vector<8x1xf32>
    %10 = vector.broadcast %9 : vector<8x1xf32> to vector<8x64xf32>
    %11 = arith.mulf %1, %10 : vector<8x64xf32>
    %c0_4 = arith.constant 0 : index
    %c0_5 = arith.constant 0 : index
    %12 = vector.load %arg2[%c0_4, %c0_5] : memref<1x64xf32, #tpu.memory_space<vmem>>, vector<1x64xf32>
    %13 = vector.broadcast %12 : vector<1x64xf32> to vector<8x64xf32>
    %14 = arith.mulf %11, %13 : vector<8x64xf32>
    %15 = arith.truncf %14 : vector<8x64xf32> to vector<8x64xbf16>
    %c0_6 = arith.constant 0 : index
    %c0_7 = arith.constant 0 : index
    %16 = vector.load %arg3[%c0_6, %c0_7] : memref<64x128xbf16, #tpu.memory_space<vmem>>, vector<64x128xbf16>
    %cst_8 = arith.constant dense<0.000000e+00> : vector<8x128xf32>
    %17 = tpu.matmul %15, %16, %cst_8 {dimension_numbers = #tpu.dot_dimension_numbers<[1], [0], [0], [1], [0, 0, 1, 1], [], []>} : vector<8x64xbf16>, vector<64x128xbf16>, vector<8x128xf32> -> vector<8x128xf32>
    %c0_9 = arith.constant 0 : index
    %c0_10 = arith.constant 0 : index
    %c0_11 = arith.constant 0 : index
    %18 = vector.load %arg6[%c0_9, %c0_10, %c0_11] : memref<1x8x16xf32, #tpu.memory_space<vmem>>, vector<1x8x16xf32>
    %19 = vector.shape_cast %18 : vector<1x8x16xf32> to vector<8x16xf32>
    %c0_12 = arith.constant 0 : index
    %c0_13 = arith.constant 0 : index
    %c0_14 = arith.constant 0 : index
    %20 = vector.load %arg7[%c0_12, %c0_13, %c0_14] : memref<1x8x16xf32, #tpu.memory_space<vmem>>, vector<1x8x16xf32>
    %21 = vector.shape_cast %20 : vector<1x8x16xf32> to vector<8x16xf32>
    %22 = tpu.iota {dimensions = array<i32: 0>} : vector<8x8xi32>
    %23 = tpu.iota {dimensions = array<i32: 1>} : vector<8x8xi32>
    %24 = arith.cmpi sle, %23, %22 : vector<8x8xi32>
    %cst_15 = arith.constant 0.000000e+00 : f32
    %cst_16 = arith.constant -1.000000e+09 : f32
    %25 = vector.broadcast %cst_15 : f32 to vector<8x8xf32>
    %26 = vector.broadcast %cst_16 : f32 to vector<8x8xf32>
    %27 = arith.select %24, %25, %26 : vector<8x8xi1>, vector<8x8xf32>
    %28 = vector.extract_strided_slice %17 {offsets = [0, 64], sizes = [8, 16], strides = [1, 1]} : vector<8x128xf32> to vector<8x16xf32>
    %29 = vector.extract_strided_slice %17 {offsets = [0, 96], sizes = [8, 16], strides = [1, 1]} : vector<8x128xf32> to vector<8x16xf32>
    %30 = arith.mulf %28, %19 : vector<8x16xf32>
    %31 = vector.extract_strided_slice %28 {offsets = [0, 8], sizes = [8, 8], strides = [1, 1]} : vector<8x16xf32> to vector<8x8xf32>
    %cst_17 = arith.constant 0.000000e+00 : f32
    %32 = vector.broadcast %cst_17 : f32 to vector<8x8xf32>
    %33 = arith.subf %32, %31 : vector<8x8xf32>
    %34 = vector.extract_strided_slice %28 {offsets = [0, 0], sizes = [8, 8], strides = [1, 1]} : vector<8x16xf32> to vector<8x8xf32>
    %35 = tpu.concatenate %33, %34 in 1 : vector<8x8xf32>, vector<8x8xf32> -> vector<8x16xf32>
    %36 = arith.mulf %35, %21 : vector<8x16xf32>
    %37 = arith.addf %30, %36 : vector<8x16xf32>
    %38 = arith.mulf %37, %37 : vector<8x16xf32>
    %cst_18 = arith.constant dense<0.000000e+00> : vector<8xf32>
    %39 = vector.multi_reduction <add>, %38, %cst_18 [1] : vector<8x16xf32> to vector<8xf32>
    %40 = vector.shape_cast %39 : vector<8xf32> to vector<8x1xf32>
    %cst_19 = arith.constant 1.600000e+01 : f32
    %41 = vector.broadcast %cst_19 : f32 to vector<8x1xf32>
    %42 = arith.divf %40, %41 : vector<8x1xf32>
    %cst_20 = arith.constant 9.99999997E-7 : f32
    %43 = vector.broadcast %cst_20 : f32 to vector<8x1xf32>
    %44 = arith.addf %42, %43 : vector<8x1xf32>
    %45 = math.rsqrt %44 : vector<8x1xf32>
    %46 = vector.broadcast %45 : vector<8x1xf32> to vector<8x16xf32>
    %47 = arith.mulf %37, %46 : vector<8x16xf32>
    %c0_21 = arith.constant 0 : index
    %c0_22 = arith.constant 0 : index
    %48 = vector.load %arg5[%c0_21, %c0_22] : memref<1x16xf32, #tpu.memory_space<vmem>>, vector<1x16xf32>
    %49 = vector.broadcast %48 : vector<1x16xf32> to vector<8x16xf32>
    %50 = arith.mulf %47, %49 : vector<8x16xf32>
    %51 = arith.truncf %50 : vector<8x16xf32> to vector<8x16xbf16>
    %52 = arith.truncf %29 : vector<8x16xf32> to vector<8x16xbf16>
    %53 = vector.extract_strided_slice %17 {offsets = [0, 80], sizes = [8, 16], strides = [1, 1]} : vector<8x128xf32> to vector<8x16xf32>
    %54 = vector.extract_strided_slice %17 {offsets = [0, 112], sizes = [8, 16], strides = [1, 1]} : vector<8x128xf32> to vector<8x16xf32>
    %55 = arith.mulf %53, %19 : vector<8x16xf32>
    %56 = vector.extract_strided_slice %53 {offsets = [0, 8], sizes = [8, 8], strides = [1, 1]} : vector<8x16xf32> to vector<8x8xf32>
    %cst_23 = arith.constant 0.000000e+00 : f32
    %57 = vector.broadcast %cst_23 : f32 to vector<8x8xf32>
    %58 = arith.subf %57, %56 : vector<8x8xf32>
    %59 = vector.extract_strided_slice %53 {offsets = [0, 0], sizes = [8, 8], strides = [1, 1]} : vector<8x16xf32> to vector<8x8xf32>
    %60 = tpu.concatenate %58, %59 in 1 : vector<8x8xf32>, vector<8x8xf32> -> vector<8x16xf32>
    %61 = arith.mulf %60, %21 : vector<8x16xf32>
    %62 = arith.addf %55, %61 : vector<8x16xf32>
    %63 = arith.mulf %62, %62 : vector<8x16xf32>
    %cst_24 = arith.constant dense<0.000000e+00> : vector<8xf32>
    %64 = vector.multi_reduction <add>, %63, %cst_24 [1] : vector<8x16xf32> to vector<8xf32>
    %65 = vector.shape_cast %64 : vector<8xf32> to vector<8x1xf32>
    %cst_25 = arith.constant 1.600000e+01 : f32
    %66 = vector.broadcast %cst_25 : f32 to vector<8x1xf32>
    %67 = arith.divf %65, %66 : vector<8x1xf32>
    %cst_26 = arith.constant 9.99999997E-7 : f32
    %68 = vector.broadcast %cst_26 : f32 to vector<8x1xf32>
    %69 = arith.addf %67, %68 : vector<8x1xf32>
    %70 = math.rsqrt %69 : vector<8x1xf32>
    %71 = vector.broadcast %70 : vector<8x1xf32> to vector<8x16xf32>
    %72 = arith.mulf %62, %71 : vector<8x16xf32>
    %c0_27 = arith.constant 0 : index
    %c0_28 = arith.constant 0 : index
    %73 = vector.load %arg5[%c0_27, %c0_28] : memref<1x16xf32, #tpu.memory_space<vmem>>, vector<1x16xf32>
    %74 = vector.broadcast %73 : vector<1x16xf32> to vector<8x16xf32>
    %75 = arith.mulf %72, %74 : vector<8x16xf32>
    %76 = arith.truncf %75 : vector<8x16xf32> to vector<8x16xbf16>
    %77 = arith.truncf %54 : vector<8x16xf32> to vector<8x16xbf16>
    %78 = vector.extract_strided_slice %17 {offsets = [0, 0], sizes = [8, 16], strides = [1, 1]} : vector<8x128xf32> to vector<8x16xf32>
    %79 = arith.mulf %78, %19 : vector<8x16xf32>
    %80 = vector.extract_strided_slice %78 {offsets = [0, 8], sizes = [8, 8], strides = [1, 1]} : vector<8x16xf32> to vector<8x8xf32>
    %cst_29 = arith.constant 0.000000e+00 : f32
    %81 = vector.broadcast %cst_29 : f32 to vector<8x8xf32>
    %82 = arith.subf %81, %80 : vector<8x8xf32>
    %83 = vector.extract_strided_slice %78 {offsets = [0, 0], sizes = [8, 8], strides = [1, 1]} : vector<8x16xf32> to vector<8x8xf32>
    %84 = tpu.concatenate %82, %83 in 1 : vector<8x8xf32>, vector<8x8xf32> -> vector<8x16xf32>
    %85 = arith.mulf %84, %21 : vector<8x16xf32>
    %86 = arith.addf %79, %85 : vector<8x16xf32>
    %87 = arith.truncf %86 : vector<8x16xf32> to vector<8x16xbf16>
    %88 = tpu.transpose %51, [1, 0] : vector<8x16xbf16> -> vector<16x8xbf16>
    %cst_30 = arith.constant dense<0.000000e+00> : vector<8x8xf32>
    %89 = tpu.matmul %87, %88, %cst_30 {dimension_numbers = #tpu.dot_dimension_numbers<[1], [0], [0], [1], [0, 0, 1, 1], [], []>} : vector<8x16xbf16>, vector<16x8xbf16>, vector<8x8xf32> -> vector<8x8xf32>
    %cst_31 = arith.constant 2.500000e-01 : f32
    %90 = vector.broadcast %cst_31 : f32 to vector<8x8xf32>
    %91 = arith.mulf %89, %90 : vector<8x8xf32>
    %92 = arith.addf %91, %27 : vector<8x8xf32>
    %cst_32 = arith.constant dense<0xFF800000> : vector<8xf32>
    %93 = vector.multi_reduction <maximumf>, %92, %cst_32 [1] : vector<8x8xf32> to vector<8xf32>
    %94 = vector.shape_cast %93 : vector<8xf32> to vector<8x1xf32>
    %95 = vector.broadcast %94 : vector<8x1xf32> to vector<8x8xf32>
    %96 = arith.subf %92, %95 : vector<8x8xf32>
    %97 = math.exp %96 : vector<8x8xf32>
    %cst_33 = arith.constant dense<0.000000e+00> : vector<8xf32>
    %98 = vector.multi_reduction <add>, %97, %cst_33 [1] : vector<8x8xf32> to vector<8xf32>
    %99 = vector.shape_cast %98 : vector<8xf32> to vector<8x1xf32>
    %100 = tpu.reciprocal %99 {approx = true} : vector<8x1xf32> -> vector<8x1xf32>
    %101 = vector.broadcast %100 : vector<8x1xf32> to vector<8x8xf32>
    %102 = arith.mulf %97, %101 : vector<8x8xf32>
    %103 = arith.truncf %102 : vector<8x8xf32> to vector<8x8xbf16>
    %cst_34 = arith.constant dense<0.000000e+00> : vector<8x16xf32>
    %104 = tpu.matmul %103, %52, %cst_34 {dimension_numbers = #tpu.dot_dimension_numbers<[1], [0], [0], [1], [0, 0, 1, 1], [], []>} : vector<8x8xbf16>, vector<8x16xbf16>, vector<8x16xf32> -> vector<8x16xf32>
    %105 = vector.extract_strided_slice %17 {offsets = [0, 16], sizes = [8, 16], strides = [1, 1]} : vector<8x128xf32> to vector<8x16xf32>
    %106 = arith.mulf %105, %19 : vector<8x16xf32>
    %107 = vector.extract_strided_slice %105 {offsets = [0, 8], sizes = [8, 8], strides = [1, 1]} : vector<8x16xf32> to vector<8x8xf32>
    %cst_35 = arith.constant 0.000000e+00 : f32
    %108 = vector.broadcast %cst_35 : f32 to vector<8x8xf32>
    %109 = arith.subf %108, %107 : vector<8x8xf32>
    %110 = vector.extract_strided_slice %105 {offsets = [0, 0], sizes = [8, 8], strides = [1, 1]} : vector<8x16xf32> to vector<8x8xf32>
    %111 = tpu.concatenate %109, %110 in 1 : vector<8x8xf32>, vector<8x8xf32> -> vector<8x16xf32>
    %112 = arith.mulf %111, %21 : vector<8x16xf32>
    %113 = arith.addf %106, %112 : vector<8x16xf32>
    %114 = arith.truncf %113 : vector<8x16xf32> to vector<8x16xbf16>
    %115 = tpu.transpose %51, [1, 0] : vector<8x16xbf16> -> vector<16x8xbf16>
    %cst_36 = arith.constant dense<0.000000e+00> : vector<8x8xf32>
    %116 = tpu.matmul %114, %115, %cst_36 {dimension_numbers = #tpu.dot_dimension_numbers<[1], [0], [0], [1], [0, 0, 1, 1], [], []>} : vector<8x16xbf16>, vector<16x8xbf16>, vector<8x8xf32> -> vector<8x8xf32>
    %cst_37 = arith.constant 2.500000e-01 : f32
    %117 = vector.broadcast %cst_37 : f32 to vector<8x8xf32>
    %118 = arith.mulf %116, %117 : vector<8x8xf32>
    %119 = arith.addf %118, %27 : vector<8x8xf32>
    %cst_38 = arith.constant dense<0xFF800000> : vector<8xf32>
    %120 = vector.multi_reduction <maximumf>, %119, %cst_38 [1] : vector<8x8xf32> to vector<8xf32>
    %121 = vector.shape_cast %120 : vector<8xf32> to vector<8x1xf32>
    %122 = vector.broadcast %121 : vector<8x1xf32> to vector<8x8xf32>
    %123 = arith.subf %119, %122 : vector<8x8xf32>
    %124 = math.exp %123 : vector<8x8xf32>
    %cst_39 = arith.constant dense<0.000000e+00> : vector<8xf32>
    %125 = vector.multi_reduction <add>, %124, %cst_39 [1] : vector<8x8xf32> to vector<8xf32>
    %126 = vector.shape_cast %125 : vector<8xf32> to vector<8x1xf32>
    %127 = tpu.reciprocal %126 {approx = true} : vector<8x1xf32> -> vector<8x1xf32>
    %128 = vector.broadcast %127 : vector<8x1xf32> to vector<8x8xf32>
    %129 = arith.mulf %124, %128 : vector<8x8xf32>
    %130 = arith.truncf %129 : vector<8x8xf32> to vector<8x8xbf16>
    %cst_40 = arith.constant dense<0.000000e+00> : vector<8x16xf32>
    %131 = tpu.matmul %130, %52, %cst_40 {dimension_numbers = #tpu.dot_dimension_numbers<[1], [0], [0], [1], [0, 0, 1, 1], [], []>} : vector<8x8xbf16>, vector<8x16xbf16>, vector<8x16xf32> -> vector<8x16xf32>
    %132 = vector.extract_strided_slice %17 {offsets = [0, 32], sizes = [8, 16], strides = [1, 1]} : vector<8x128xf32> to vector<8x16xf32>
    %133 = arith.mulf %132, %19 : vector<8x16xf32>
    %134 = vector.extract_strided_slice %132 {offsets = [0, 8], sizes = [8, 8], strides = [1, 1]} : vector<8x16xf32> to vector<8x8xf32>
    %cst_41 = arith.constant 0.000000e+00 : f32
    %135 = vector.broadcast %cst_41 : f32 to vector<8x8xf32>
    %136 = arith.subf %135, %134 : vector<8x8xf32>
    %137 = vector.extract_strided_slice %132 {offsets = [0, 0], sizes = [8, 8], strides = [1, 1]} : vector<8x16xf32> to vector<8x8xf32>
    %138 = tpu.concatenate %136, %137 in 1 : vector<8x8xf32>, vector<8x8xf32> -> vector<8x16xf32>
    %139 = arith.mulf %138, %21 : vector<8x16xf32>
    %140 = arith.addf %133, %139 : vector<8x16xf32>
    %141 = arith.truncf %140 : vector<8x16xf32> to vector<8x16xbf16>
    %142 = tpu.transpose %76, [1, 0] : vector<8x16xbf16> -> vector<16x8xbf16>
    %cst_42 = arith.constant dense<0.000000e+00> : vector<8x8xf32>
    %143 = tpu.matmul %141, %142, %cst_42 {dimension_numbers = #tpu.dot_dimension_numbers<[1], [0], [0], [1], [0, 0, 1, 1], [], []>} : vector<8x16xbf16>, vector<16x8xbf16>, vector<8x8xf32> -> vector<8x8xf32>
    %cst_43 = arith.constant 2.500000e-01 : f32
    %144 = vector.broadcast %cst_43 : f32 to vector<8x8xf32>
    %145 = arith.mulf %143, %144 : vector<8x8xf32>
    %146 = arith.addf %145, %27 : vector<8x8xf32>
    %cst_44 = arith.constant dense<0xFF800000> : vector<8xf32>
    %147 = vector.multi_reduction <maximumf>, %146, %cst_44 [1] : vector<8x8xf32> to vector<8xf32>
    %148 = vector.shape_cast %147 : vector<8xf32> to vector<8x1xf32>
    %149 = vector.broadcast %148 : vector<8x1xf32> to vector<8x8xf32>
    %150 = arith.subf %146, %149 : vector<8x8xf32>
    %151 = math.exp %150 : vector<8x8xf32>
    %cst_45 = arith.constant dense<0.000000e+00> : vector<8xf32>
    %152 = vector.multi_reduction <add>, %151, %cst_45 [1] : vector<8x8xf32> to vector<8xf32>
    %153 = vector.shape_cast %152 : vector<8xf32> to vector<8x1xf32>
    %154 = tpu.reciprocal %153 {approx = true} : vector<8x1xf32> -> vector<8x1xf32>
    %155 = vector.broadcast %154 : vector<8x1xf32> to vector<8x8xf32>
    %156 = arith.mulf %151, %155 : vector<8x8xf32>
    %157 = arith.truncf %156 : vector<8x8xf32> to vector<8x8xbf16>
    %cst_46 = arith.constant dense<0.000000e+00> : vector<8x16xf32>
    %158 = tpu.matmul %157, %77, %cst_46 {dimension_numbers = #tpu.dot_dimension_numbers<[1], [0], [0], [1], [0, 0, 1, 1], [], []>} : vector<8x8xbf16>, vector<8x16xbf16>, vector<8x16xf32> -> vector<8x16xf32>
    %159 = vector.extract_strided_slice %17 {offsets = [0, 48], sizes = [8, 16], strides = [1, 1]} : vector<8x128xf32> to vector<8x16xf32>
    %160 = arith.mulf %159, %19 : vector<8x16xf32>
    %161 = vector.extract_strided_slice %159 {offsets = [0, 8], sizes = [8, 8], strides = [1, 1]} : vector<8x16xf32> to vector<8x8xf32>
    %cst_47 = arith.constant 0.000000e+00 : f32
    %162 = vector.broadcast %cst_47 : f32 to vector<8x8xf32>
    %163 = arith.subf %162, %161 : vector<8x8xf32>
    %164 = vector.extract_strided_slice %159 {offsets = [0, 0], sizes = [8, 8], strides = [1, 1]} : vector<8x16xf32> to vector<8x8xf32>
    %165 = tpu.concatenate %163, %164 in 1 : vector<8x8xf32>, vector<8x8xf32> -> vector<8x16xf32>
    %166 = arith.mulf %165, %21 : vector<8x16xf32>
    %167 = arith.addf %160, %166 : vector<8x16xf32>
    %168 = arith.truncf %167 : vector<8x16xf32> to vector<8x16xbf16>
    %169 = tpu.transpose %76, [1, 0] : vector<8x16xbf16> -> vector<16x8xbf16>
    %cst_48 = arith.constant dense<0.000000e+00> : vector<8x8xf32>
    %170 = tpu.matmul %168, %169, %cst_48 {dimension_numbers = #tpu.dot_dimension_numbers<[1], [0], [0], [1], [0, 0, 1, 1], [], []>} : vector<8x16xbf16>, vector<16x8xbf16>, vector<8x8xf32> -> vector<8x8xf32>
    %cst_49 = arith.constant 2.500000e-01 : f32
    %171 = vector.broadcast %cst_49 : f32 to vector<8x8xf32>
    %172 = arith.mulf %170, %171 : vector<8x8xf32>
    %173 = arith.addf %172, %27 : vector<8x8xf32>
    %cst_50 = arith.constant dense<0xFF800000> : vector<8xf32>
    %174 = vector.multi_reduction <maximumf>, %173, %cst_50 [1] : vector<8x8xf32> to vector<8xf32>
    %175 = vector.shape_cast %174 : vector<8xf32> to vector<8x1xf32>
    %176 = vector.broadcast %175 : vector<8x1xf32> to vector<8x8xf32>
    %177 = arith.subf %173, %176 : vector<8x8xf32>
    %178 = math.exp %177 : vector<8x8xf32>
    %cst_51 = arith.constant dense<0.000000e+00> : vector<8xf32>
    %179 = vector.multi_reduction <add>, %178, %cst_51 [1] : vector<8x8xf32> to vector<8xf32>
    %180 = vector.shape_cast %179 : vector<8xf32> to vector<8x1xf32>
    %181 = tpu.reciprocal %180 {approx = true} : vector<8x1xf32> -> vector<8x1xf32>
    %182 = vector.broadcast %181 : vector<8x1xf32> to vector<8x8xf32>
    %183 = arith.mulf %178, %182 : vector<8x8xf32>
    %184 = arith.truncf %183 : vector<8x8xf32> to vector<8x8xbf16>
    %cst_52 = arith.constant dense<0.000000e+00> : vector<8x16xf32>
    %185 = tpu.matmul %184, %77, %cst_52 {dimension_numbers = #tpu.dot_dimension_numbers<[1], [0], [0], [1], [0, 0, 1, 1], [], []>} : vector<8x8xbf16>, vector<8x16xbf16>, vector<8x16xf32> -> vector<8x16xf32>
    %186 = tpu.concatenate %104, %131, %158, %185 in 1 : vector<8x16xf32>, vector<8x16xf32>, vector<8x16xf32>, vector<8x16xf32> -> vector<8x64xf32>
    %187 = arith.truncf %186 : vector<8x64xf32> to vector<8x64xbf16>
    %c0_53 = arith.constant 0 : index
    %c0_54 = arith.constant 0 : index
    %188 = vector.load %arg4[%c0_53, %c0_54] : memref<64x64xbf16, #tpu.memory_space<vmem>>, vector<64x64xbf16>
    %cst_55 = arith.constant dense<0.000000e+00> : vector<8x64xf32>
    %189 = tpu.matmul %187, %188, %cst_55 {dimension_numbers = #tpu.dot_dimension_numbers<[1], [0], [0], [1], [0, 0, 1, 1], [], []>} : vector<8x64xbf16>, vector<64x64xbf16>, vector<8x64xf32> -> vector<8x64xf32>
    %190 = arith.addf %1, %189 : vector<8x64xf32>
    %c0_56 = arith.constant 0 : index
    %c0_57 = arith.constant 0 : index
    %c0_58 = arith.constant 0 : index
    %191 = vector.load %arg8[%c0_56, %c0_57, %c0_58] : memref<1x8x64xf32, #tpu.memory_space<vmem>>, vector<1x8x64xf32>
    %192 = vector.shape_cast %191 : vector<1x8x64xf32> to vector<8x64xf32>
    %193 = vector.shape_cast %190 : vector<8x64xf32> to vector<1x8x64xf32>
    tpu.vector_store %arg8[%c0_56, %c0_57, %c0_58], %193 {strides = array<i32>} : memref<1x8x64xf32, #tpu.memory_space<vmem>>, vector<1x8x64xf32>,
    return
  }
  func.func @transform_0(%arg0: i32) -> (i32, i32, i32) {
    %c0_i32 = arith.constant 0 : i32
    %c0_i32_0 = arith.constant 0 : i32
    %c0_i32_1 = arith.constant 0 : i32
    return %arg0, %c0_i32, %c0_i32_0 : i32, i32, i32
  }
  func.func @transform_1(%arg0: i32) -> (i32, i32) {
    %c0_i32 = arith.constant 0 : i32
    %c0_i32_0 = arith.constant 0 : i32
    %c0_i32_1 = arith.constant 0 : i32
    return %c0_i32, %c0_i32_0 : i32, i32
  }
  func.func @transform_2(%arg0: i32) -> (i32, i32) {
    %c0_i32 = arith.constant 0 : i32
    %c0_i32_0 = arith.constant 0 : i32
    %c0_i32_1 = arith.constant 0 : i32
    return %c0_i32, %c0_i32_0 : i32, i32
  }
  func.func @transform_3(%arg0: i32) -> (i32, i32) {
    %c0_i32 = arith.constant 0 : i32
    %c0_i32_0 = arith.constant 0 : i32
    %c0_i32_1 = arith.constant 0 : i32
    return %c0_i32, %c0_i32_0 : i32, i32
  }
  func.func @transform_4(%arg0: i32) -> (i32, i32) {
    %c0_i32 = arith.constant 0 : i32
    %c0_i32_0 = arith.constant 0 : i32
    %c0_i32_1 = arith.constant 0 : i32
    return %c0_i32, %c0_i32_0 : i32, i32
  }
  func.func @transform_5(%arg0: i32) -> (i32, i32, i32) {
    %c0_i32 = arith.constant 0 : i32
    %c0_i32_0 = arith.constant 0 : i32
    %c0_i32_1 = arith.constant 0 : i32
    return %arg0, %c0_i32, %c0_i32_0 : i32, i32, i32
  }
  func.func @transform_6(%arg0: i32) -> (i32, i32, i32) {
    %c0_i32 = arith.constant 0 : i32
    %c0_i32_0 = arith.constant 0 : i32
    %c0_i32_1 = arith.constant 0 : i32
    return %arg0, %c0_i32, %c0_i32_0 : i32, i32, i32
  }
  func.func @transform_7(%arg0: i32) -> (i32, i32, i32) {
    %c0_i32 = arith.constant 0 : i32
    %c0_i32_0 = arith.constant 0 : i32
    %c0_i32_1 = arith.constant 0 : i32
    return %arg0, %c0_i32, %c0_i32_0 : i32, i32, i32
  }
}

</mosaic_0001>

<bundles_post_ra>
// kernel: _lambda_.2
= control target key start
LH: loop header
LB: loop body
LE: loop exit
PB: predicated region body
PF: predicated region fallthrough
CT: control target
= control target key end

     0   :  { %s1413_s24 = smov 0   ;;  %s1642_s0 = inlined_call_operand.vmem [shape: f32[2,8,64], index: 0, kind: input, shape index: {}]   ;;  %s1643_s1 = inlined_call_operand.vmem [shape: f32[1,64], index: 1, kind: input, shape index: {}]   ;;  %s1644_s2 = inlined_call_operand.vmem [shape: bf16[64,128], index: 2, kind: input, shape index: {}]   ;;  %s1645_s3 = inlined_call_operand.vmem [shape: bf16[64,64], index: 3, kind: input, shape index: {}]   ;;  %s1646_s4 = inlined_call_operand.vmem [shape: f32[1,16], index: 4, kind: input, shape index: {}]   ;;  %s1647_s5 = inlined_call_operand.vmem [shape: f32[2,8,16], index: 5, kind: input, shape index: {}]   ;;  %s1648_s6 = inlined_call_operand.vmem [shape: f32[2,8,16], index: 6, kind: input, shape index: {}]   ;;  %s1649_s7 = inlined_call_operand.vmem [shape: f32[2,8,64], index: 7, kind: output, shape index: {}]  }
   0x1 LB: > { %s1164_s25 = sadd.s32 4294967295, %s1354_s24   ;;  %p1168_p0 = scmp.ge.s32.totalorder %s1354_s24, 1  ;;  %s1354_s24 = sphi %s1413_s24, %s17_s24  }
   0x2   : > { %p254_p1 = scmp.lt.s32.totalorder %s1354_s24, 3 }
   0x4   : > { %p255_p2 = pnand %p1168_p0, %p254_p1 }
   0x5   : > { %p292_p3 = scmp.lt.s32.totalorder (!%p255_p2), %s1164_s25, 1  ;;  %s1358_s17 = smov (!%p255_p2), 72  }
   0x6   : > { %258 = sbr.rel (%p255_p2) target bundleno = 2614 (0xa36), region = 48  ;;  %s1359_s21 = smov (!%p255_p2), 56  }
   0x7   : > { %s1361_s27 = smov (!%p255_p2), 120   ;;  %s1362_s8 = smov (!%p255_p2), 8  }
   0x8   : > { %s1363_s9 = smov (!%p255_p2), 40   ;;  %s1364_s10 = smov (!%p255_p2), 80  }
   0x9   : > { %s1365_s11 = smov (!%p255_p2), 104   ;;  %s1366_s12 = smov (!%p255_p2), 88  }
   0xa   : > { %s1367_s13 = smov (!%p255_p2), 48   ;;  %s1369_s14 = smov (!%p255_p2), 16  }
   0xb   : > { %s1651_s25 = smov (!%p292_p3, %s1164_s25), 1  ;;  %vm311_vm0 = vcmask 523264   ;;  %v1318_v3 = vld [vmem:[%s1644_s2 + $0x18] sm:$0xff]   ;;  %v1356_v4 = vmov 0.0   ;;  %vm1357_vm1 = vmmov 0   ;;  %v1319_v5 = vld [vmem:[%s1644_s2 + $0x10] sm:$0xff]   ;;  %v406_v61 = vlaneseq }
   0xc   : > { %s1421_s26 = sshll.u32 %s1651_s25, 3  ;;  %1221 = vmatprep.subr.bf16.mxu0 %v1356_v4  ;;  %1229 = vmatprep.mubr.msk.bf16.mxu0 %vm1357_vm1, %v1356_v4  ;;  %v1320_v6 = vld [vmem:[%s1644_s2 + $0x8] sm:$0xff]   ;;  %v1321_v7 = vld [vmem:[%s1644_s2] sm:$0xff]   ;;  %s1360_s25 = smov 64   ;;  %vm426_vm2 = vcmask 64512   ;;  %vm439_vm3 = vcmask 130048  }
   0xd   : > { %s295_s29 = scalar_lea.vmem %s1642_s0, %s1421_s26  ;;  %1222 = vmatpush3.bf16.msra.mxu0 %v1318_v3  ;;  %1233 = vmatprep.subr.bf16.mxu1 %v1356_v4  ;;  %v1173_v12 = vld [vmem:[%s1643_s1] ss:$0 sm:$0xff]  ;;  %s299_s20 = scalar_lea.vmem %s1647_s5, %s1421_s26  ;;  %v407_v62 = vshrl.u32 %v406_v61, 7  ;;  %v409_v63 = vand.u32 127, %v406_v61  ;;  %vm574_vm5 = vcmask 1043456   ;;  %vm1005_vm6 = vcmask 261120  }
   0xe   : > { %v1427_v0 = vld [vmem:[%s295_s29] sm:$0xff]  ;;  %1223 = vmatprep.subr.bf16.mxu0 %v1356_v4  ;;  %1235 = vmatprep.mubr.msk.bf16.mxu1 %vm1357_vm1, %v1356_v4  ;;  %s303_s30 = scalar_lea.vmem %s1648_s6, %s1421_s26  ;;  %s1370_s15 = smov 32   ;;  %vm1007_vm7 = vcmask 392192  }
   0xf   : > { %v310_v1 = vmul.f32 %v1427_v0, %v1427_v0  ;;  %v1474_v20 = vld [vmem:[%s299_s20] sm:$0xff]  ;;  %vm410_vm4 = vcmp.le.s32.totalorder %v409_v63, %v407_v62  ;;  %s1371_s16 = smov 112  }
  0x10   : > { %v1479_v21 = vld [vmem:[%s1646_s4] ss:$0 sm:$0xff] }
  0x11   : > { %v312_v2 = vsel %vm311_vm0, %v310_v1, 0.0  ;;  %1224 = vmatpush3.bf16.msra.mxu0 %v1319_v5  ;;  %v1491_v23 = vld [vmem:[%s303_s30] sm:$0xff]  ;;  %s307_s30 = scalar_lea.vmem %s1649_s7, %s1421_s26 }
  0x12   : > { %313 = vadd.xlane.f32.xlu0 %v312_v2  ;;  %1225 = vmatprep.subr.bf16.mxu0 %v1356_v4  ;;  %v1368_v2 = vmov -1e+09  }
  0x13   : > { %v1534_v3 = vsel %vm410_vm4, 0.0, %v1368_v2 }
  0x15   : > { %1226 = vmatpush3.bf16.msra.mxu0 %v1320_v6 }
  0x16   : > { %1227 = vmatprep.subr.bf16.mxu0 %v1356_v4 }
  0x19   : > { %1228 = vmatpush3.bf16.msra.mxu0 %v1321_v7 }
  0x1a   : > { %1257 = vmatprep.subr.bf16.mxu0 %v1356_v4 }
  0x9b   : > { %v314_v8 = vpop.xlane.xlu0 %313 }
  0x9c   : > { %v316_v9 = vmul.f32 0.015625, %v314_v8 }
  0x9e   : > { %v317_v10 = vadd.f32 1e-06, %v316_v9 }
  0xa0   : > { %1326 = vrsqrt.f32 %v317_v10 }
  0xad   : > { %v1327_v11 = vpop.eup %1326 }
  0xae   : > { %v319_v13 = vmul.f32 %v1327_v11, %v1427_v0 }
  0xb0   : > { %v327_v14 = vmul.f32 %v1173_v12, %v319_v13 }
  0xb2   : > { %v328_v15 = vpack.c.bf16 %v327_v14, %v327_v14 }
  0xb4   : > { %1230 = vmatmul.mubr.msk.bf16.vlgmr.msra.gmra.mxu0 %vm311_vm0, %v328_v15 }
  0xb5   : > { %1259 = vmatprep.mubr.msk.bf16.mxu0 %vm1357_vm1, %v1356_v4 }
 0x174   : > { %v1461_v16 = vpop.f32.mrf.mxu0 }
 0x175   : > { %423 = vrot.lane.b32.xlu1 %v1461_v16, %s1358_s17  ;;  %v1466_v17 = vsub.f32 0.0, %v1461_v16  ;;  %v494_v48 = vmul.f32 %v1474_v20, %v1461_v16 }
 0x176   : > { %v1231_v18 = vpop.f32.mrf.mxu0 }
 0x177   : > { %419 = vrot.lane.b32.xlu0 %v1466_v17, %s1359_s21 }
 0x178   : > { %v401_v19 = vpop.f32.mrf.mxu0 }
 0x179   : > { %413 = vrot.lane.b32.xlu1 %v1474_v20, %s1360_s25 }
 0x17a   : > { %v1232_v22 = vpop.f32.mrf.mxu0 }
 0x17b   : > { %454 = vrot.lane.b32.xlu0 %v1479_v21, %s1360_s25 }
 0x17f   : > { %495 = vrot.lane.b32.xlu0 %v1466_v17, %s1361_s27 }
 0x1e7   : > { %v424_v24 = vpop.permute.xlu1 %423 }
 0x1e9   : > { %v420_v25 = vpop.permute.xlu0 %419 }
 0x1ea   : > { %v427_v26 = vsel %vm426_vm2, %v420_v25, %v424_v24  ;;  %v1556_v24 = vpack.c.bf16 %v1461_v16, %v1461_v16 }
 0x1eb   : > { %v428_v27 = vmul.f32 %v427_v26, %v1491_v23  ;;  %v414_v28 = vpop.permute.xlu1 %413 }
 0x1ec   : > { %v416_v29 = vmul.f32 %v414_v28, %v1461_v16 }
 0x1ed   : > { %430 = vrot.lane.b32.xlu1 %v428_v27, %s1360_s25  ;;  %v455_v40 = vpop.permute.xlu0 %454 }
 0x1f1   : > { %v496_v43 = vpop.permute.xlu0 %495 }
 0x25f   : > { %v431_v30 = vpop.permute.xlu1 %430 }
 0x260   : > { %v433_v31 = vadd.f32 %v431_v30, %v416_v29 }
 0x262   : > { %v434_v32 = vmul.f32 %v433_v31, %v433_v31 }
 0x264   : > { %436 = vrot.lane.b32.xlu1 %v434_v32, %s1360_s25 }
 0x2d6   : > { %v437_v33 = vpop.permute.xlu1 %436 }
 0x2d7   : > { %v440_v34 = vsel %vm439_vm3, %v437_v33, 0.0 }
 0x2d8   : > { %441 = vadd.xlane.f32.xlu1 %v440_v34 }
 0x361   : > { %v442_v35 = vpop.xlane.xlu1 %441 }
 0x362   : > { %v444_v36 = vmul.f32 0.0625, %v442_v35 }
 0x364   : > { %v445_v37 = vadd.f32 1e-06, %v444_v36 }
 0x366   : > { %1328 = vrsqrt.f32 %v445_v37 }
 0x373   : > { %v1329_v38 = vpop.eup %1328 }
 0x374   : > { %v447_v39 = vmul.f32 %v1329_v38, %v433_v31 }
 0x376   : > { %v457_v41 = vmul.f32 %v455_v40, %v447_v39 }
 0x378   : > { %v458_v42 = vpack.c.bf16 %v457_v41, %v457_v41 }
 0x37a   : > { %506 = vrot.lane.b32.xlu0 %v458_v42, %s1360_s25 }
 0x37e   : > { %498 = vrot.lane.b32.xlu0 %v1461_v16, %s1362_s8 }
 0x382   : > { %464 = vrot.lane.b32.xlu0 %v1466_v17, %s1363_s9 }
 0x386   : > { %467 = vrot.lane.b32.xlu0 %v1461_v16, %s1359_s21 }
 0x38a   : > { %460 = vrot.lane.b32.xlu0 %v1474_v20, %s1364_s10 }
 0x3ec   : > { %v507_v44 = vpop.permute.xlu0 %506 }
 0x3ed   : > { %v1507_v45 = vsel %vm439_vm3, %v507_v44, 0 }
 0x3ee   : > { %1234 = vmatpush3.bf16.xpose.msra.mxu1 %v1507_v45 }
 0x3ef   : > { %1239 = vmatprep.subr.bf16.mxu1 %v1356_v4 }
 0x3f0   : > { %v499_v46 = vpop.permute.xlu0 %498 }
 0x3f1   : > { %v501_v47 = vsel %vm426_vm2, %v496_v43, %v499_v46 }
 0x3f2   : > { %v502_v49 = vmul.f32 %v501_v47, %v1491_v23 }
 0x3f4   : > { %v503_v50 = vadd.f32 %v502_v49, %v494_v48  ;;  %v465_v51 = vpop.permute.xlu0 %464 }
 0x3f6   : > { %v504_v52 = vpack.c.bf16 %v503_v50, %v503_v50 }
 0x3f8   : > { %1236 = vmatmul.mubr.msk.bf16.vlgmr.msra.gmra.mxu1 %vm439_vm3, %v504_v52  ;;  %v468_v53 = vpop.permute.xlu0 %467 }
 0x3f9   : > { %v470_v54 = vsel %vm426_vm2, %v465_v51, %v468_v53  ;;  %1241 = vmatprep.mubr.msk.bf16.mxu1 %vm1357_vm1, %v1356_v4 }
 0x3fa   : > { %v471_v55 = vmul.f32 %v470_v54, %v1491_v23 }
 0x3fc   : > { %473 = vrot.lane.b32.xlu1 %v471_v55, %s1364_s10  ;;  %v461_v56 = vpop.permute.xlu0 %460 }
 0x3fd   : > { %v463_v57 = vmul.f32 %v461_v56, %v1461_v16 }
 0x400   : > { %622 = vrot.lane.b32.xlu1 %v1466_v17, %s1365_s11 }
 0x404   : > { %625 = vrot.lane.b32.xlu1 %v1461_v16, %s1361_s27 }
 0x408   : > { %743 = vrot.lane.b32.xlu1 %v1466_v17, %s1366_s12 }
 0x40c   : > { %746 = vrot.lane.b32.xlu1 %v1461_v16, %s1365_s11 }
 0x410   : > { %875 = vrot.lane.b32.xlu1 %v1466_v17, %s1358_s17  ;;  %s1372_s17 = smov 96  }
 0x46e   : > { %v474_v58 = vpop.permute.xlu1 %473 }
 0x46f   : > { %v1529_v59 = vadd.f32 %v474_v58, %v463_v57 }
 0x471   : > { %v477_v60 = vmul.f32 %v1529_v59, %v1529_v59 }
 0x472   : > { %v623_v11 = vpop.permute.xlu1 %622 }
 0x473   : > { %479 = vrot.lane.b32.xlu0 %v477_v60, %s1367_s13 }
 0x476   : > { %v626_v12 = vpop.permute.xlu1 %625 }
 0x477   : > { %v628_v13 = vsel %vm426_vm2, %v623_v11, %v626_v12 }
 0x478   : > { %v629_v14 = vmul.f32 %v628_v13, %v1491_v23 }
 0x47a   : > { %v744_v18 = vpop.permute.xlu1 %743 }
 0x47e   : > { %v747_v19 = vpop.permute.xlu1 %746 }
 0x47f   : > { %v749_v22 = vsel %vm426_vm2, %v744_v18, %v747_v19 }
 0x482   : > { %v876_v26 = vpop.permute.xlu1 %875 }
 0x4b8   : > { %v548_v1 = vpop.f32.mrf.mxu1 }
 0x4b9   : > { %v554_v5 = vmul.f32 0.25, %v548_v1 }
 0x4ba   : > { %v1237_v6 = vpop.f32.mrf.mxu1 }
 0x4bb   : > { %v555_v7 = vadd.f32 %v554_v5, %v1534_v3 }
 0x4bc   : > { %v551_v8 = vpop.f32.mrf.mxu1 }
 0x4bd   : > { %v556_v9 = vsel %vm426_vm2, %v555_v7, -inf }
 0x4be   : > { %v1238_v10 = vpop.f32.mrf.mxu1  ;;  %557 = vmax.xlane.f32.xlu0 %v556_v9 }
 0x4d4   : > { %878 = vrot.lane.b32.xlu0 %v1461_v16, %s1366_s12 }
 0x4d8   : > { %618 = vrot.lane.b32.xlu0 %v1474_v20, %s1369_s14 }
 0x4dc   : > { %489 = vrot.lane.b32.xlu0 %v1479_v21, %s1364_s10  ;;  %v750_v21 = vmul.f32 %v749_v22, %v1491_v23 }
 0x4e0   : > { %631 = vrot.lane.b32.xlu0 %v629_v14, %s1369_s14 }
 0x4e4   : > { %739 = vrot.lane.b32.xlu0 %v1474_v20, %s1370_s15 }
 0x4e5   : > { %v480_v15 = vpop.permute.xlu0 %479 }
 0x4e6   : > { %v482_v17 = vsel %vm439_vm3, %v480_v15, 0.0 }
 0x4e7   : > { %483 = vadd.xlane.f32.xlu1 %v482_v17 }
 0x4e8   : > { %871 = vrot.lane.b32.xlu0 %v1474_v20, %s1367_s13 }
 0x4f8   : > { %752 = vrot.lane.b32.xlu1 %v750_v21, %s1370_s15 }
 0x4fc   : > { %569 = vrot.lane.b32.xlu1 %v1556_v24, %s1370_s15 }
 0x547   : > { %v558_v25 = vpop.xlane.xlu0 %557 }
 0x548   : > { %v559_v31 = vsub.f32 %v555_v7, %v558_v25 }
 0x54a   : > { %v560_v35 = vmul.f32 1.442695, %v559_v31 }
 0x54b   : > { %v879_v27 = vpop.permute.xlu0 %878 }
 0x54c   : > { %v881_v20 = vsel %vm426_vm2, %v876_v26, %v879_v27  ;;  %1330 = vpow2.f32 %v560_v35 }
 0x54d   : > { %v882_v28 = vmul.f32 %v881_v20, %v1491_v23 }
 0x54f   : > { %884 = vrot.lane.b32.xlu0 %v882_v28, %s1367_s13  ;;  %v619_v29 = vpop.permute.xlu0 %618 }
 0x550   : > { %v621_v32 = vmul.f32 %v619_v29, %v1461_v16 }
 0x553   : > { %v490_v30 = vpop.permute.xlu0 %489 }
 0x557   : > { %v632_v33 = vpop.permute.xlu0 %631 }
 0x558   : > { %v634_v34 = vadd.f32 %v632_v33, %v621_v32 }
 0x559   : > { %v1331_v37 = vpop.eup %1330 }
 0x55a   : > { %v635_v36 = vpack.c.bf16 %v634_v34, %v634_v34  ;;  %v562_v38 = vsel %vm426_vm2, %v1331_v37, 0.0 }
 0x55b   : > { %v740_v46 = vpop.permute.xlu0 %739 }
 0x55c   : > { %637 = vrot.lane.b32.xlu1 %v635_v36, %s1371_s16  ;;  %v742_v48 = vmul.f32 %v740_v46, %v1461_v16 }
 0x55f   : > { %v872_v53 = vpop.permute.xlu0 %871 }
 0x560   : > { %v874_v54 = vmul.f32 %v872_v53, %v1461_v16 }
 0x56e   : > { %563 = vadd.xlane.f32.xlu0 %v562_v38 }
 0x570   : > { %v484_v39 = vpop.xlane.xlu1 %483 }
 0x571   : > { %v485_v23 = vmul.f32 0.0625, %v484_v39 }
 0x573   : > { %v486_v40 = vadd.f32 1e-06, %v485_v23 }
 0x574   : > { %v753_v41 = vpop.permute.xlu1 %752 }
 0x575   : > { %1332 = vrsqrt.f32 %v486_v40  ;;  %v755_v50 = vadd.f32 %v753_v41, %v742_v48 }
 0x577   : > { %v756_v52 = vpack.c.bf16 %v755_v50, %v755_v50 }
 0x578   : > { %v570_v42 = vpop.permute.xlu1 %569 }
 0x579   : > { %v576_v43 = vsel %vm574_vm5, %v570_v42, 0 }
 0x57a   : > { %1240 = vmatpush3.bf16.msra.mxu1 %v576_v43 }
 0x57b   : > { %1245 = vmatprep.subr.bf16.mxu1 %v1356_v4 }
 0x582   : > { %v1333_v44 = vpop.eup %1332 }
 0x583   : > { %v488_v47 = vmul.f32 %v1333_v44, %v1529_v59 }
 0x585   : > { %v492_v49 = vmul.f32 %v490_v30, %v488_v47 }
 0x587   : > { %v493_v51 = vpack.c.bf16 %v492_v49, %v492_v49 }
 0x589   : > { %761 = vrot.lane.b32.xlu1 %v493_v51, %s1367_s13 }
 0x58d   : > { %758 = vrot.lane.b32.xlu1 %v756_v52, %s1372_s17 }
 0x5c1   : > { %v885_v55 = vpop.permute.xlu0 %884 }
 0x5c2   : > { %v887_v56 = vadd.f32 %v885_v55, %v874_v54 }
 0x5c4   : > { %v888_v57 = vpack.c.bf16 %v887_v56, %v887_v56 }
 0x5c6   : > { %890 = vrot.lane.b32.xlu1 %v888_v57, %s1364_s10 }
 0x5ce   : > { %v638_v58 = vpop.permute.xlu1 %637 }
 0x5f7   : > { %v564_v59 = vpop.xlane.xlu0 %563 }
 0x5f8   : > { %1334 = vrcp.f32 %v564_v59  ;;  %v1322_v59 = vld [vmem:[%s1645_s3 + $0x18] sm:$0xff]  }
 0x5fb   : > { %v762_v60 = vpop.permute.xlu1 %761 }
 0x5fc   : > { %v767_v61 = vsel %vm439_vm3, %v762_v60, 0 }
 0x5fd   : > { %1258 = vmatpush3.bf16.xpose.msra.mxu0 %v767_v61 }
 0x5fe   : > { %1269 = vmatprep.subr.bf16.mxu0 %v1356_v4 }
 0x5ff   : > { %v759_v62 = vpop.permute.xlu1 %758 }
 0x604   : > { %1260 = vmatmul.mubr.msk.bf16.vlgmr.msra.gmra.mxu0 %vm439_vm3, %v759_v62 }
 0x605   : > { %v1335_v63 = vpop.eup %1334  ;;  %1270 = vmatpush3.bf16.xpose.msra.mxu0 %v767_v61  ;;  %1271 = vmatprep.mubr.msk.bf16.mxu0 %vm1357_vm1, %v1356_v4 }
 0x606   : > { %v566_v16 = vmul.f32 %v1335_v63, %v1331_v37  ;;  %1281 = vmatprep.subr.bf16.mxu0 %v1356_v4 }
 0x608   : > { %v567_v1 = vpack.c.bf16 %v566_v16, %v566_v16  ;;  %v1323_v16 = vld [vmem:[%s1645_s3 + $0x10] sm:$0xff]  }
 0x60a   : > { %1242 = vmatmul.mubr.msk.bf16.vlgmr.msra.gmra.mxu1 %vm426_vm2, %v567_v1  ;;  %v1324_v1 = vld [vmem:[%s1645_s3 + $0x8] sm:$0xff]  }
 0x60b   : > { %1246 = vmatpush3.bf16.xpose.msra.mxu1 %v1507_v45  ;;  %1247 = vmatprep.mubr.msk.bf16.mxu1 %vm1357_vm1, %v1356_v4 }
 0x60c   : > { %1251 = vmatprep.subr.bf16.mxu1 %v1356_v4 }
 0x612   : > { %1248 = vmatmul.mubr.msk.bf16.vlgmr.msra.gmra.mxu1 %vm439_vm3, %v638_v58 }
 0x613   : > { %1252 = vmatpush3.bf16.msra.mxu1 %v576_v43  ;;  %1253 = vmatprep.mubr.msk.bf16.mxu1 %vm1357_vm1, %v1356_v4 }
 0x614   : > { %1263 = vmatprep.subr.bf16.mxu1 %v1356_v4 }
 0x638   : > { %v891_v2 = vpop.permute.xlu1 %890 }
 0x639   : > { %1272 = vmatmul.mubr.msk.bf16.vlgmr.msra.gmra.mxu0 %vm439_vm3, %v891_v2  ;;  %v1325_v2 = vld [vmem:[%s1645_s3] sm:$0xff]  }
 0x63a   : > { %1289 = vmatprep.mubr.msk.bf16.mxu0 %vm1357_vm1, %v1356_v4  ;;  %1282 = vmatpush3.bf16.msra.mxu0 %v1322_v59 }
 0x63b   : > { %1283 = vmatprep.subr.bf16.mxu0 %v1356_v4 }
 0x63e   : > { %1284 = vmatpush3.bf16.msra.mxu0 %v1323_v16 }
 0x63f   : > { %1285 = vmatprep.subr.bf16.mxu0 %v1356_v4 }
 0x642   : > { %1286 = vmatpush3.bf16.msra.mxu0 %v1324_v1 }
 0x643   : > { %1287 = vmatprep.subr.bf16.mxu0 %v1356_v4 }
 0x646   : > { %1288 = vmatpush3.bf16.msra.mxu0 %v1325_v2 }
 0x6c4   : > { %v803_v45 = vpop.f32.mrf.mxu0 }
 0x6c5   : > { %v809_v5 = vmul.f32 0.25, %v803_v45 }
 0x6c6   : > { %v1261_v6 = vpop.f32.mrf.mxu0 }
 0x6c7   : > { %v810_v7 = vadd.f32 %v809_v5, %v1534_v3 }
 0x6c8   : > { %v806_v8 = vpop.f32.mrf.mxu0 }
 0x6c9   : > { %v811_v9 = vsel %vm426_vm2, %v810_v7, -inf }
 0x6ca   : > { %v1592_v10 = vpop.f32.mrf.mxu1  ;;  %812 = vmax.xlane.f32.xlu0 %v811_v9  ;;  %v1262_v11 = vpop.f32.mrf.mxu0 }
 0x6cc   : > { %v1243_v12 = vpop.f32.mrf.mxu1 }
 0x6ce   : > { %v615_v13 = vpop.f32.mrf.mxu1 }
 0x6d0   : > { %v1244_v14 = vpop.f32.mrf.mxu1 }
 0x6d2   : > { %v676_v15 = vpop.f32.mrf.mxu1 }
 0x6d3   : > { %v682_v17 = vmul.f32 0.25, %v676_v15 }
 0x6d4   : > { %v1249_v18 = vpop.f32.mrf.mxu1 }
 0x6d5   : > { %v683_v19 = vadd.f32 %v682_v17, %v1534_v3 }
 0x6d6   : > { %v679_v22 = vpop.f32.mrf.mxu1 }
 0x6d7   : > { %v684_v21 = vsel %vm426_vm2, %v683_v19, -inf }
 0x6d8   : > { %685 = vmax.xlane.f32.xlu1 %v684_v21  ;;  %v1250_v25 = vpop.f32.mrf.mxu1 }
 0x6f9   : > { %v929_v26 = vpop.f32.mrf.mxu0 }
 0x6fa   : > { %v935_v27 = vmul.f32 0.25, %v929_v26 }
 0x6fb   : > { %v1273_v20 = vpop.f32.mrf.mxu0 }
 0x6fc   : > { %v936_v28 = vadd.f32 %v935_v27, %v1534_v3 }
 0x6fd   : > { %v932_v29 = vpop.f32.mrf.mxu0 }
 0x6fe   : > { %v937_v30 = vsel %vm426_vm2, %v936_v28, -inf }
 0x6ff   : > { %938 = vmax.xlane.f32.xlu0 %v937_v30  ;;  %v1274_v31 = vpop.f32.mrf.mxu0 }
 0x753   : > { %v813_v32 = vpop.xlane.xlu0 %812 }
 0x754   : > { %v814_v33 = vsub.f32 %v810_v7, %v813_v32 }
 0x756   : > { %v815_v34 = vmul.f32 1.442695, %v814_v33 }
 0x758   : > { %1336 = vpow2.f32 %v815_v34 }
 0x761   : > { %v686_v35 = vpop.xlane.xlu1 %685 }
 0x762   : > { %v687_v36 = vsub.f32 %v683_v19, %v686_v35 }
 0x764   : > { %v688_v37 = vmul.f32 1.442695, %v687_v36 }
 0x765   : > { %v1337_v38 = vpop.eup %1336 }
 0x766   : > { %1338 = vpow2.f32 %v688_v37  ;;  %v817_v39 = vsel %vm426_vm2, %v1337_v38, 0.0 }
 0x767   : > { %818 = vadd.xlane.f32.xlu0 %v817_v39 }
 0x773   : > { %v1339_v23 = vpop.eup %1338 }
 0x774   : > { %v690_v3 = vsel %vm426_vm2, %v1339_v23, 0.0 }
 0x775   : > { %691 = vadd.xlane.f32.xlu0 %v690_v3 }
 0x788   : > { %v939_v40 = vpop.xlane.xlu0 %938 }
 0x789   : > { %v940_v41 = vsub.f32 %v936_v28, %v939_v40 }
 0x78b   : > { %v941_v42 = vmul.f32 1.442695, %v940_v41 }
 0x78d   : > { %1340 = vpow2.f32 %v941_v42 }
 0x79a   : > { %v1341_v43 = vpop.eup %1340 }
 0x79b   : > { %v943_v44 = vsel %vm426_vm2, %v1341_v43, 0.0 }
 0x79c   : > { %944 = vadd.xlane.f32.xlu0 %v943_v44 }
 0x7b2   : > { %823 = vrot.lane.b32.xlu0 %v1556_v24, %s1369_s14 }
 0x7f0   : > { %v819_v46 = vpop.xlane.xlu0 %818 }
 0x7fe   : > { %v692_v47 = vpop.xlane.xlu0 %691 }
 0x7ff   : > { %1342 = vrcp.f32 %v692_v47 }
 0x800   : > { %1344 = vrcp.f32 %v819_v46 }
 0x80c   : > { %v1343_v48 = vpop.eup %1342 }
 0x80d   : > { %v694_v49 = vmul.f32 %v1343_v48, %v1339_v23  ;;  %v1345_v51 = vpop.eup %1344 }
 0x80e   : > { %v821_v53 = vmul.f32 %v1345_v51, %v1337_v38 }
 0x80f   : > { %v695_v50 = vpack.c.bf16 %v694_v49, %v694_v49 }
 0x810   : > { %v822_v24 = vpack.c.bf16 %v821_v53, %v821_v53 }
 0x811   : > { %1254 = vmatmul.mubr.msk.bf16.vlgmr.msra.gmra.mxu1 %vm426_vm2, %v695_v50 }
 0x812   : > { %1265 = vmatprep.mubr.msk.bf16.mxu1 %vm1357_vm1, %v1356_v4 }
 0x825   : > { %v945_v52 = vpop.xlane.xlu0 %944 }
 0x826   : > { %1346 = vrcp.f32 %v945_v52 }
 0x829   : > { %v824_v54 = vpop.permute.xlu0 %823 }
 0x82a   : > { %v829_v55 = vsel %vm574_vm5, %v824_v54, 0 }
 0x82b   : > { %1264 = vmatpush3.bf16.msra.mxu1 %v829_v55 }
 0x82c   : > { %1275 = vmatprep.subr.bf16.mxu1 %v1356_v4 }
 0x82e   : > { %1266 = vmatmul.mubr.msk.bf16.vlgmr.msra.gmra.mxu1 %vm426_vm2, %v822_v24 }
 0x82f   : > { %1276 = vmatpush3.bf16.msra.mxu1 %v829_v55  ;;  %1277 = vmatprep.mubr.msk.bf16.mxu1 %vm1357_vm1, %v1356_v4 }
 0x833   : > { %v1347_v56 = vpop.eup %1346 }
 0x834   : > { %v947_v57 = vmul.f32 %v1347_v56, %v1341_v43 }
 0x836   : > { %v948_v58 = vpack.c.bf16 %v947_v57, %v947_v57 }
 0x838   : > { %1278 = vmatmul.mubr.msk.bf16.vlgmr.msra.gmra.mxu1 %vm426_vm2, %v948_v58 }
 0x8d1   : > { %v733_v60 = vpop.f32.mrf.mxu1 }
 0x8d2   : > { %993 = vrot.lane.b32.xlu1 %v733_v60, %s1369_s14 }
 0x8d3   : > { %v1255_v61 = vpop.f32.mrf.mxu1 }
 0x8d5   : > { %v736_v62 = vpop.f32.mrf.mxu1 }
 0x8d7   : > { %v1256_v63 = vpop.f32.mrf.mxu1 }
 0x8ee   : > { %v865_v45 = vpop.f32.mrf.mxu1 }
 0x8ef   : > { %997 = vrot.lane.b32.xlu0 %v865_v45, %s1370_s15 }
 0x8f0   : > { %v1267_v5 = vpop.f32.mrf.mxu1 }
 0x8f2   : > { %v868_v6 = vpop.f32.mrf.mxu1 }
 0x8f4   : > { %v1268_v7 = vpop.f32.mrf.mxu1 }
 0x8f8   : > { %v986_v8 = vpop.f32.mrf.mxu1 }
 0x8f9   : > { %1001 = vrot.lane.b32.xlu0 %v986_v8, %s1367_s13 }
 0x8fa   : > { %v1279_v9 = vpop.f32.mrf.mxu1 }
 0x8fc   : > { %v989_v11 = vpop.f32.mrf.mxu1 }
 0x8fe   : > { %v1280_v12 = vpop.f32.mrf.mxu1 }
 0x944   : > { %v994_v13 = vpop.permute.xlu1 %993 }
 0x945   : > { %v1004_v14 = vsel %vm439_vm3, %v1592_v10, %v994_v13 }
 0x961   : > { %v998_v4 = vpop.permute.xlu0 %997 }
 0x962   : > { %v1006_v15 = vsel %vm1005_vm6, %v1004_v14, %v998_v4 }
 0x96b   : > { %v1002_v17 = vpop.permute.xlu0 %1001 }
 0x96c   : > { %v1008_v18 = vsel %vm1007_vm7, %v1006_v15, %v1002_v17 }
 0x96d   : > { %v1009_v19 = vpack.c.bf16 %v1008_v18, %v1008_v18 }
 0x96f   : > { %1290 = vmatmul.mubr.msk.bf16.vlgmr.msra.gmra.mxu0 %vm311_vm0, %v1009_v19 }
 0xa2f   : > { %v1079_v22 = vpop.f32.mrf.mxu0 }
 0xa30   : > { %v1085_v21 = vadd.f32 %v1079_v22, %v1427_v0 }
 0xa31   : > { %v1291_v25 = vpop.f32.mrf.mxu0 }
 0xa32   : > { %1086 = vst.msk [vmem:[%s307_s30] sm:$0xff] %vm311_vm0, %v1085_v21 }
 0xa33   : > { %v1082_v26 = vpop.f32.mrf.mxu0 }
 0xa35   : > { %v1292_v27 = vpop.f32.mrf.mxu0 }
 0xa36 PF: > { %s17_s24 = sadd.s32 1, %s1354_s24  }
 0xa37   : > { %p14_p4 = scmp.ge.s32.totalorder %s17_s24, 4  }
 0xa39   :  { %16 = sbr.rel (!%p14_p4) target bundleno = 1 (0x1), region = 84 }

// kernel: _lambda_.3
= control target key start
LH: loop header
LB: loop body
LE: loop exit
PB: predicated region body
PF: predicated region fallthrough
CT: control target
= control target key end

     0   :  { %10 = vsyncpa [#allocation3], 0  ;;  %s2255_s0 = inlined_call_operand.vmem [shape: f32[16,64], index: 0, kind: input, shape index: {}]   ;;  %s2256_s1 = inlined_call_operand.vmem [shape: f32[1,64], index: 1, kind: input, shape index: {}]   ;;  %s2257_s2 = inlined_call_operand.vmem [shape: f32[64,128], index: 2, kind: input, shape index: {}]   ;;  %s2258_s3 = inlined_call_operand.vmem [shape: bf16[4,64,256], index: 3, kind: input, shape index: {}]   ;;  %s2259_s4 = inlined_call_operand.vmem [shape: bf16[4,128,64], index: 4, kind: input, shape index: {}]   ;;  %s2260_s5 = inlined_call_operand.hbm [shape: f32[16,64], index: 5, kind: output, shape index: {}]  }
   0x1   :  { %12 = vsyncpa [#allocation3 + $0x1], 0  ;;  %s1849_s18 = smov 0   ;;  %s1851_s19 = smov 0  }
   0x2   :  { %s1853_s20 = smov 0   ;;  %s1855_s21 = smov 0  }
   0x3 LB: > { %s1870_s22 = sadd.s32 4294967295, %s1809_s21   ;;  %s1292_s23 = sadd.s32 4294967294, %s1809_s21   ;;  %s1809_s21 = sphi %s1855_s21, %s2266_s21   ;;  %s1805_s20 = sphi %s1853_s20, %s2265_s20   ;;  %s1801_s19 = sphi %s1851_s19, %s2264_s19   ;;  %s1797_s18 = sphi %s1849_s18, %s2263_s18  }
   0x4   : > { %s1874_s24 = sadd.s32 1, %s1809_s21   ;;  %s135_s25 = sadd.s32 1, %s1805_s20 }
   0x5   : > { %s132_s26 = ssub.s32 %s1809_s21, %s1874_s24  ;;  %p145_p0 = scmp.ne.s32.totalorder %s1805_s20, %s1801_s19 }
   0x6   : > { %p133_p1 = scmp.eq.s32.totalorder %s132_s26, 0  ;;  %p146_p2 = scmp.eq.s32.totalorder %s1870_s22, 1 }
   0x7   : > { %p151_p3 = scmp.ne.s32.totalorder %s1801_s19, %s1797_s18  ;;  %p152_p4 = scmp.eq.s32.totalorder %s1292_s23, 1 }
   0x8   : > { %s1885_s27 = scalar_select %p133_p1, %s1805_s20, %s135_s25  }
   0x9   : > { %p1887_p5 = por %p146_p2, %p145_p0  ;;  %p1891_p6 = por %p152_p4, %p151_p3 }
   0xa   : > { %p1295_p7 = scmp.ge.s32.totalorder %s1809_s21, 1  ;;  %p189_p8 = scmp.lt.s32.totalorder %s1809_s21, 3 }
   0xc   : > { %p190_p9 = pnand %p1295_p7, %p189_p8 }
   0xd   : > { %p216_p10 = scmp.lt.s32.totalorder (!%p190_p9), %s1870_s22, 1  ;;  %s1815_s12 = smov (!%p190_p9), 124  }
   0xe   : > { %193 = sbr.rel (%p190_p9) target bundleno = 1410 (0x582), region = 40  ;;  %s213_s13 = sand.u32 (!%p190_p9), 1, %s1801_s19  }
   0xf   : > { %s1296_s14 = sshll.u32 (!%p190_p9), %s213_s13, 3  ;;  %s1447_s15 = sshll.u32 (!%p190_p9), %s1870_s22, 7 }
  0x10   : > { %s215_s16 = scalar_lea.vmem (!%p190_p9), [#allocation2], %s1296_s14  ;;  %s1231_s26 = scalar_lea.hbm (!%p190_p9), %s2260_s5, %s1447_s15 }
  0x11   : > { %s1233_s17 = sshll.u32 (!%p190_p9), %s215_s16, 4  ;;  %s1818_s7 = smov (!%p190_p9), [#allocation2]   ;;  %s1234_s17 = int_to_ptr.vmem [resolvable:$true] %s1233_s17 }
  0x13   : > { %s217_s30 = scalar_select %p216_p10, %s1870_s22, 1  ;;  %vm223_vm0 = vcmask 523264   ;;  %v247_v3 = vld [vmem:[%s2257_s2 + $0x38] sm:$0xff]  ;;  %v1811_v6 = vmov 0.0   ;;  %v246_v7 = vld [vmem:[%s2257_s2 + $0x30] sm:$0xff]  ;;  %v245_v9 = vld [vmem:[%s2257_s2 + $0x28] sm:$0xff]  ;;  %v321_v55 = vlaneseq }
  0x14   : > { %v1645_v4 = vld [vmem:[%s2258_s3 + $0x34] ss:$8 sps:$4 sm:$0xff]   ;;  %v1647_v5 = vld [vmem:[%s2258_s3 + $0x30] ss:$8 sps:$4 sm:$0xff]   ;;  %1495 = vmatprep.subr.mxu0 %v1811_v6  ;;  %v1648_v8 = vld [vmem:[%s2258_s3 + $0x24] ss:$8 sps:$4 sm:$0xff]  }
  0x15   : > { %s1297_s6 = sshll.u32 %s217_s30, 3  ;;  %1496 = vmatpush3.msra.mxu0 %v247_v3  ;;  %434 = vmatprep.subr.bf16.mxu1 %v1645_v4  ;;  %v1650_v10 = vld [vmem:[%s2258_s3 + $0x20] ss:$8 sps:$4 sm:$0xff]   ;;  %v1651_v12 = vld [vmem:[%s2258_s3 + $0x14] ss:$8 sps:$4 sm:$0xff]   ;;  %vm1812_vm1 = vmmov 0  }
  0x16   : > { %s219_s9 = scalar_lea.vmem %s2255_s0, %s1297_s6  ;;  %1497 = vmatprep.subr.mxu0 %v1811_v6  ;;  %435 = vmatpush1.bf16.msra.mxu1 %v1647_v5  ;;  %v244_v11 = vld [vmem:[%s2257_s2 + $0x20] sm:$0xff]  ;;  %v243_v13 = vld [vmem:[%s2257_s2 + $0x18] sm:$0xff]  ;;  %v242_v16 = vld [vmem:[%s2257_s2 + $0x10] sm:$0xff]  ;;  %v1813_v21 = vmov 0   ;;  %v2077_v56 = vand.u32 127, %v321_v55  ;;  %vm328_vm4 = vcmask 72704  }
  0x17   : > { %v1902_v0 = vld [vmem:[%s219_s9] sm:$0xff]  ;;  %1498 = vmatpush3.msra.mxu0 %v246_v7  ;;  %436 = vmatprep.subr.bf16.mxu1 %v1648_v8  ;;  %v1653_v14 = vld [vmem:[%s2258_s3 + $0x10] ss:$8 sps:$4 sm:$0xff]   ;;  %v241_v17 = vld [vmem:[%s2257_s2 + $0x8] sm:$0xff]  ;;  %s1220_s30 = scalar_lea.sflag [#allocation3], %s213_s13  ;;  %s1749_s6 = scalar_lea.vmem %s1234_s17, 128 }
  0x18   : > { %v222_v1 = vmul.f32 %v1902_v0, %v1902_v0  ;;  %1499 = vmatprep.subr.mxu0 %v1811_v6  ;;  %1511 = vmatprep.mubr.msk.f32.mxu0 %vm1812_vm1, %v1811_v6  ;;  %v1654_v15 = vld [vmem:[%s2258_s3 + $0x4] ss:$8 sps:$4 sm:$0xff]   ;;  %v1656_v18 = vld [vmem:[%s2258_s3] ss:$8 sps:$4 sm:$0xff]   ;;  %v1659_v20 = vld [vmem:[%s2258_s3 + $0x74] ss:$8 sps:$4 sm:$0xff]   ;;  %p1750_p11 = scmp.ne.s32.totalorder %s1234_s17, %s1749_s6 }
  0x19   : > { %1500 = vmatpush3.msra.mxu0 %v245_v9  ;;  %v240_v19 = vld [vmem:[%s2257_s2] sm:$0xff]  ;;  %458 = vmatprep.mubr.bf16.mxu1 %v1813_v21  ;;  %v1657_v29 = vld [vmem:[%s2258_s3 + $0x70] ss:$8 sps:$4 sm:$0xff]   ;;  %v1665_v33 = vld [vmem:[%s2258_s3 + $0x54] ss:$8 sps:$4 sm:$0xff]   ;;  %vm324_vm2 = vcmp.ge.s32.totalorder %v2077_v56, 4 }
  0x1a   : > { %v224_v2 = vsel %vm223_vm0, %v222_v1, 0.0  ;;  %1501 = vmatprep.subr.mxu0 %v1811_v6  ;;  %437 = vmatpush1.bf16.msra.mxu1 %v1650_v10  ;;  %v1298_v26 = vld [vmem:[%s2256_s1] ss:$0 sm:$0xff]  ;;  %v1662_v31 = vld [vmem:[%s2258_s3 + $0x64] ss:$8 sps:$4 sm:$0xff]   ;;  %v1669_v37 = vld [vmem:[%s2259_s4 + $0x38] sm:$0xff]   ;;  %p1751_p12 = pnand %p1750_p11, %p1887_p5 }
  0x1b   : > { %225 = vadd.xlane.f32.xlu0 %v224_v2  ;;  %1502 = vmatpush3.msra.mxu0 %v244_v11  ;;  %v1660_v32 = vld [vmem:[%s2258_s3 + $0x60] ss:$8 sps:$4 sm:$0xff]   ;;  %v1663_v34 = vld [vmem:[%s2258_s3 + $0x50] ss:$8 sps:$4 sm:$0xff]   ;;  %v1668_v35 = vld [vmem:[%s2258_s3 + $0x44] ss:$8 sps:$4 sm:$0xff]  }
  0x1c   : > { %438 = vmatprep.subr.bf16.mxu1 %v1651_v12  ;;  %1503 = vmatprep.subr.mxu0 %v1811_v6  ;;  %v1666_v36 = vld [vmem:[%s2258_s3 + $0x40] ss:$8 sps:$4 sm:$0xff]   ;;  %v1670_v38 = vld [vmem:[%s2259_s4 + $0x30] sm:$0xff]   ;;  %v1673_v41 = vld [vmem:[%s2259_s4 + $0x78] sm:$0xff]   ;;  %vm323_vm3 = vcmp.ge.s32.totalorder %v2077_v56, 8  ;;  %v325_v57 = vsel %vm324_vm2, -1.0, %v1811_v6  ;;  %p1752_p13 = pneg %p1751_p12 }
  0x1d   : > { %1504 = vmatpush3.msra.mxu0 %v243_v13  ;;  %1640 = vset.pattern.permute.xlu0 %v1813_v21  ;;  %v1671_v39 = vld [vmem:[%s2259_s4 + $0x28] sm:$0xff]   ;;  %v1672_v40 = vld [vmem:[%s2259_s4 + $0x20] sm:$0xff]   ;;  %v1674_v42 = vld [vmem:[%s2259_s4 + $0x18] sm:$0xff]   ;;  %v326_v58 = vsel %vm323_vm3, -10.0, %v325_v57  ;;  %vm352_vm5 = vcmp.lt.s32.totalorder %v2077_v56, 8  ;;  %s1753_s22 = sshll.u32 %s1818_s7, 4  ;;  %s1754_s22 = int_to_ptr.vmem [resolvable:$false] %s1753_s22 }
  0x1e   : > { %1505 = vmatprep.subr.mxu0 %v1811_v6  ;;  %439 = vmatpush1.bf16.msra.mxu1 %v1653_v14  ;;  %v1675_v43 = vld [vmem:[%s2259_s4 + $0x70] sm:$0xff]   ;;  %v1677_v45 = vld [vmem:[%s2259_s4 + $0x68] sm:$0xff]   ;;  %v1679_v47 = vld [vmem:[%s2259_s4 + $0x60] sm:$0xff]   ;;  %s1755_s8 = scalar_lea.vmem %s1754_s22, 256  ;;  %p1756_p0 = scmp.lt.s32.totalorder %s1234_s17, %s1754_s22 }
  0x1f   : > { %1506 = vmatpush3.msra.mxu0 %v242_v16  ;;  %440 = vmatprep.subr.bf16.mxu1 %v1654_v15  ;;  %v1676_v44 = vld [vmem:[%s2259_s4 + $0x10] sm:$0xff]   ;;  %v1678_v46 = vld [vmem:[%s2259_s4 + $0x8] sm:$0xff]   ;;  %v1680_v48 = vld [vmem:[%s2259_s4] sm:$0xff]   ;;  %p1757_p1 = scmp.lt.s32.totalorder %s1755_s8, %s1749_s6 }
  0x20   : > { %1507 = vmatprep.subr.mxu0 %v1811_v6  ;;  %v1681_v49 = vld [vmem:[%s2259_s4 + $0x58] sm:$0xff]   ;;  %v1685_v51 = vld [vmem:[%s2259_s4 + $0x50] sm:$0xff]   ;;  %v1689_v52 = vld [vmem:[%s2259_s4 + $0x48] sm:$0xff]  }
  0x21   : > { %1508 = vmatpush3.msra.mxu0 %v241_v17  ;;  %v1684_v50 = vld [vmem:[%s2258_s3 + $0xb4] ss:$8 sps:$4 sm:$0xff]   ;;  %v1693_v53 = vld [vmem:[%s2259_s4 + $0x40] sm:$0xff]   ;;  %v1723_v57 = vld [vmem:[%s2259_s4 + $0xc8] sm:$0xff]   ;;  %p1758_p2 = por %p1757_p1, %p1756_p0 }
  0x22   : > { %1509 = vmatprep.subr.mxu0 %v1811_v6  ;;  %441 = vmatpush1.bf16.msra.mxu1 %v1656_v18  ;;  %v1699_v54 = vld [vmem:[%s2258_s3 + $0xf4] ss:$8 sps:$4 sm:$0xff]   ;;  %v1682_v18 = vld [vmem:[%s2258_s3 + $0xb0] ss:$8 sps:$4 sm:$0xff]  }
  0x23   : > { %1510 = vmatpush3.msra.mxu0 %v240_v19  ;;  %644 = vmatprep.subr.bf16.mxu1 %v1659_v20  ;;  %v1688_v20 = vld [vmem:[%s2258_s3 + $0xa4] ss:$8 sps:$4 sm:$0xff]   ;;  %v1722_v55 = vld [vmem:[%s2259_s4 + $0xd0] sm:$0xff]   ;;  %p1759_p3 = pnand %p1758_p2, %p1752_p13 }
  0x24   : > { %1514 = vmatprep.subr.bf16.mxu0 %v1811_v6 }
  0xa4   : > { %v226_v22 = vpop.xlane.xlu0 %225 }
  0xa5   : > { %v228_v23 = vmul.f32 0.015625, %v226_v22  ;;  %v1686_v22 = vld [vmem:[%s2258_s3 + $0xa0] ss:$8 sps:$4 sm:$0xff]  }
  0xa7   : > { %v229_v24 = vadd.f32 1e-06, %v228_v23  ;;  %v1692_v23 = vld [vmem:[%s2258_s3 + $0x94] ss:$8 sps:$4 sm:$0xff]  }
  0xa9   : > { %1725 = vrsqrt.f32 %v229_v24  ;;  %v1690_v24 = vld [vmem:[%s2258_s3 + $0x90] ss:$8 sps:$4 sm:$0xff]  }
  0xb6   : > { %v1726_v25 = vpop.eup %1725 }
  0xb7   : > { %v231_v27 = vmul.f32 %v1726_v25, %v1902_v0  ;;  %v1696_v25 = vld [vmem:[%s2258_s3 + $0x84] ss:$8 sps:$4 sm:$0xff]  }
  0xb9   : > { %v239_v28 = vmul.f32 %v1298_v26, %v231_v27  ;;  %v1694_v26 = vld [vmem:[%s2258_s3 + $0x80] ss:$8 sps:$4 sm:$0xff]  }
  0xbb   : > { %1512 = vmatmul.mubr.msk.f32.vlgmr.msra.gmra.mxu0 %vm223_vm0, %v239_v28  ;;  %v1979_v30 = vpack.c.bf16 %v239_v28, %v239_v28 }
  0xbc   : > { %1530 = vmatprep.mubr.msk.bf16.mxu0 %vm1812_vm1, %v1811_v6  ;;  %1515 = vmatpush3.bf16.msra.mxu0 %v1669_v37  ;;  %v1708_v37 = vld [vmem:[%s2258_s3 + $0xc4] ss:$8 sps:$4 sm:$0xff]  }
  0xbd   : > { %1310 = vmatmul.mubr.msk.bf16.vlgmr.msra.gmra.mxu1 %vm223_vm0, %v1979_v30  ;;  %1516 = vmatprep.subr.bf16.mxu0 %v1811_v6 }
  0xbe   : > { %645 = vmatpush1.bf16.msra.mxu1 %v1657_v29  ;;  %668 = vmatprep.mubr.bf16.mxu1 %v1813_v21 }
  0xbf   : > { %646 = vmatprep.subr.bf16.mxu1 %v1662_v31  ;;  %v1697_v31 = vld [vmem:[%s2258_s3 + $0xf0] ss:$8 sps:$4 sm:$0xff]  }
  0xc0   : > { %1517 = vmatpush3.bf16.msra.mxu0 %v1670_v38  ;;  %v1709_v38 = vld [vmem:[%s2259_s4 + $0xb8] sm:$0xff]  }
  0xc1   : > { %1518 = vmatprep.subr.bf16.mxu0 %v1811_v6 }
  0xc2   : > { %647 = vmatpush1.bf16.msra.mxu1 %v1660_v32 }
  0xc3   : > { %648 = vmatprep.subr.bf16.mxu1 %v1665_v33  ;;  %v1702_v33 = vld [vmem:[%s2258_s3 + $0xe4] ss:$8 sps:$4 sm:$0xff]  }
  0xc4   : > { %1519 = vmatpush3.bf16.msra.mxu0 %v1671_v39  ;;  %v1710_v39 = vld [vmem:[%s2259_s4 + $0xb0] sm:$0xff]  }
  0xc5   : > { %1520 = vmatprep.subr.bf16.mxu0 %v1811_v6 }
  0xc6   : > { %649 = vmatpush1.bf16.msra.mxu1 %v1663_v34  ;;  %v1700_v34 = vld [vmem:[%s2258_s3 + $0xe0] ss:$8 sps:$4 sm:$0xff]  }
  0xc7   : > { %650 = vmatprep.subr.bf16.mxu1 %v1668_v35  ;;  %v1705_v35 = vld [vmem:[%s2258_s3 + $0xd4] ss:$8 sps:$4 sm:$0xff]  }
  0xc8   : > { %1521 = vmatpush3.bf16.msra.mxu0 %v1672_v40 }
  0xc9   : > { %1522 = vmatprep.subr.bf16.mxu0 %v1811_v6 }
  0xca   : > { %651 = vmatpush1.bf16.msra.mxu1 %v1666_v36  ;;  %v1703_v36 = vld [vmem:[%s2258_s3 + $0xd0] ss:$8 sps:$4 sm:$0xff]  }
  0xcb   : > { %1534 = vmatprep.subr.bf16.mxu1 %v1811_v6 }
  0xcc   : > { %1523 = vmatpush3.bf16.msra.mxu0 %v1674_v42 }
  0xcd   : > { %1336 = vmatmul.mubr.msk.bf16.vlgmr.msra.gmra.mxu1 %vm223_vm0, %v1979_v30  ;;  %1524 = vmatprep.subr.bf16.mxu0 %v1811_v6 }
  0xce   : > { %1550 = vmatprep.mubr.msk.bf16.mxu1 %vm1812_vm1, %v1811_v6  ;;  %1535 = vmatpush3.bf16.msra.mxu1 %v1673_v41  ;;  %v1712_v41 = vld [vmem:[%s2259_s4 + $0xa0] sm:$0xff]  }
  0xcf   : > { %1536 = vmatprep.subr.bf16.mxu1 %v1811_v6 }
  0xd0   : > { %1525 = vmatpush3.bf16.msra.mxu0 %v1676_v44  ;;  %v1713_v44 = vld [vmem:[%s2259_s4 + $0xf8] sm:$0xff]  }
  0xd1   : > { %1526 = vmatprep.subr.bf16.mxu0 %v1811_v6 }
  0xd2   : > { %1537 = vmatpush3.bf16.msra.mxu1 %v1675_v43 }
  0xd3   : > { %1538 = vmatprep.subr.bf16.mxu1 %v1811_v6 }
  0xd4   : > { %1527 = vmatpush3.bf16.msra.mxu0 %v1678_v46  ;;  %v1715_v46 = vld [vmem:[%s2259_s4 + $0xf0] sm:$0xff]  }
  0xd5   : > { %1528 = vmatprep.subr.bf16.mxu0 %v1811_v6 }
  0xd6   : > { %1539 = vmatpush3.bf16.msra.mxu1 %v1677_v45  ;;  %v1714_v45 = vld [vmem:[%s2259_s4 + $0x98] sm:$0xff]  }
  0xd7   : > { %1540 = vmatprep.subr.bf16.mxu1 %v1811_v6 }
  0xd8   : > { %1529 = vmatpush3.bf16.msra.mxu0 %v1680_v48  ;;  %v1717_v48 = vld [vmem:[%s2259_s4 + $0xe8] sm:$0xff]  }
  0xd9   : > { %854 = vmatprep.subr.bf16.mxu0 %v1684_v50  ;;  %v1719_v50 = vld [vmem:[%s2259_s4 + $0xe0] sm:$0xff]  }
  0xda   : > { %1541 = vmatpush3.bf16.msra.mxu1 %v1679_v47  ;;  %v1716_v47 = vld [vmem:[%s2259_s4 + $0x90] sm:$0xff]  }
  0xdb   : > { %1542 = vmatprep.subr.bf16.mxu1 %v1811_v6 }
  0xde   : > { %1543 = vmatpush3.bf16.msra.mxu1 %v1681_v49  ;;  %v1718_v49 = vld [vmem:[%s2259_s4 + $0x88] sm:$0xff]  }
  0xdf   : > { %1544 = vmatprep.subr.bf16.mxu1 %v1811_v6 }
  0xe2   : > { %1545 = vmatpush3.bf16.msra.mxu1 %v1685_v51  ;;  %v1720_v51 = vld [vmem:[%s2259_s4 + $0x80] sm:$0xff]  }
  0xe3   : > { %1546 = vmatprep.subr.bf16.mxu1 %v1811_v6 }
  0xe6   : > { %1547 = vmatpush3.bf16.msra.mxu1 %v1689_v52 }
  0xe7   : > { %1548 = vmatprep.subr.bf16.mxu1 %v1811_v6 }
  0xea   : > { %1549 = vmatpush3.bf16.msra.mxu1 %v1693_v53 }
  0xeb   : > { %1064 = vmatprep.subr.bf16.mxu1 %v1699_v54  ;;  %v1721_v54 = vld [vmem:[%s2259_s4 + $0xd8] sm:$0xff]  }
 0x17b   : > { %v317_v59 = vpop.f32.mrf.mxu0 }
 0x17c   : > { %v2082_v60 = vadd.f32 %v326_v58, %v317_v59  ;;  %v1724_v58 = vld [vmem:[%s2259_s4 + $0xc0] sm:$0xff]  }
 0x17d   : > { %v1513_v61 = vpop.f32.mrf.mxu0  ;;  %v460_v62 = vpop.f32.mrf.mxu1 }
 0x17e   : > { %v1311_v63 = vmul.f32 -1.442695, %v460_v62  ;;  %v329_v1 = vsel %vm328_vm4, %v2082_v60, -inf }
 0x17f   : > { %v462_v2 = vpop.f32.mrf.mxu1  ;;  %330 = vmax.xlane.f32.xlu0 %v329_v1 }
 0x180   : > { %1727 = vpow2.f32 %v1311_v63 }
 0x181   : > { %v464_v3 = vpop.f32.mrf.mxu1 }
 0x183   : > { %v465_v4 = vpop.f32.mrf.mxu1 }
 0x18d   : > { %v1728_v5 = vpop.eup %1727  ;;  %v670_v7 = vpop.f32.mrf.mxu1 }
 0x18e   : > { %v470_v8 = vadd.f32 1.0, %v1728_v5  ;;  %v1337_v9 = vmul.f32 -1.442695, %v670_v7 }
 0x18f   : > { %v672_v10 = vpop.f32.mrf.mxu1 }
 0x190   : > { %1729 = vrcp.f32 %v470_v8 }
 0x191   : > { %1731 = vpow2.f32 %v1337_v9  ;;  %v674_v11 = vpop.f32.mrf.mxu1 }
 0x193   : > { %v675_v12 = vpop.f32.mrf.mxu1 }
 0x19d   : > { %v1730_v13 = vpop.eup %1729 }
 0x19e   : > { %v1732_v14 = vpop.eup %1731  ;;  %v473_v15 = vmul.f32 %v1730_v13, %v460_v62 }
 0x19f   : > { %v680_v16 = vadd.f32 1.0, %v1732_v14 }
 0x1a0   : > { %v474_v17 = vmul.f32 %v473_v15, %v462_v2 }
 0x1a1   : > { %1733 = vrcp.f32 %v680_v16 }
 0x1a2   : > { %v475_v19 = vpack.c.bf16 %v474_v17, %v474_v17 }
 0x1a4   : > { %1531 = vmatmul.mubr.bf16.vlgmr.msra.gmra.mxu0 %v475_v19 }
 0x1a5   : > { %855 = vmatpush1.bf16.msra.mxu0 %v1682_v18  ;;  %878 = vmatprep.mubr.bf16.mxu0 %v1813_v21 }
 0x1a6   : > { %856 = vmatprep.subr.bf16.mxu0 %v1688_v20 }
 0x1a9   : > { %857 = vmatpush1.bf16.msra.mxu0 %v1686_v22 }
 0x1aa   : > { %858 = vmatprep.subr.bf16.mxu0 %v1692_v23 }
 0x1ad   : > { %859 = vmatpush1.bf16.msra.mxu0 %v1690_v24 }
 0x1ae   : > { %v1734_v27 = vpop.eup %1733  ;;  %860 = vmatprep.subr.bf16.mxu0 %v1696_v25 }
 0x1af   : > { %v683_v28 = vmul.f32 %v1734_v27, %v670_v7 }
 0x1b1   : > { %v684_v29 = vmul.f32 %v683_v28, %v672_v10  ;;  %861 = vmatpush1.bf16.msra.mxu0 %v1694_v26 }
 0x1b2   : > { %1554 = vmatprep.subr.bf16.mxu0 %v1811_v6 }
 0x1b3   : > { %v685_v32 = vpack.c.bf16 %v684_v29, %v684_v29 }
 0x1b4   : > { %1378 = vmatmul.mubr.msk.bf16.vlgmr.msra.gmra.mxu0 %vm223_vm0, %v1979_v30 }
 0x1b5   : > { %1551 = vmatmul.mubr.bf16.vlgmr.msra.gmra.mxu1 %v685_v32  ;;  %1570 = vmatprep.mubr.msk.bf16.mxu0 %vm1812_vm1, %v1811_v6 }
 0x1b6   : > { %1065 = vmatpush1.bf16.msra.mxu1 %v1697_v31  ;;  %1088 = vmatprep.mubr.bf16.mxu1 %v1813_v21  ;;  %v1706_v21 = vld [vmem:[%s2258_s3 + $0xc0] ss:$8 sps:$4 sm:$0xff]  }
 0x1b7   : > { %1066 = vmatprep.subr.bf16.mxu1 %v1702_v33  ;;  %1555 = vmatpush3.bf16.msra.mxu0 %v1709_v38  ;;  %v1301_v33 = vsel %vm352_vm5, 1.0, %v1811_v6 }
 0x1b8   : > { %1556 = vmatprep.subr.bf16.mxu0 %v1811_v6 }
 0x1ba   : > { %1067 = vmatpush1.bf16.msra.mxu1 %v1700_v34  ;;  %v360_v34 = vsub.f32 1.0, %v1301_v33 }
 0x1bb   : > { %1068 = vmatprep.subr.bf16.mxu1 %v1705_v35  ;;  %1557 = vmatpush3.bf16.msra.mxu0 %v1710_v39 }
 0x1bc   : > { %1558 = vmatprep.subr.bf16.mxu0 %v1811_v6 }
 0x1be   : > { %1069 = vmatpush1.bf16.msra.mxu1 %v1703_v36 }
 0x1bf   : > { %1070 = vmatprep.subr.bf16.mxu1 %v1708_v37 }
 0x1c2   : > { %1071 = vmatpush1.bf16.msra.mxu1 %v1706_v21 }
 0x1c3   : > { %1574 = vmatprep.subr.bf16.mxu1 %v1811_v6 }
 0x1c5   : > { %1420 = vmatmul.mubr.msk.bf16.vlgmr.msra.gmra.mxu1 %vm223_vm0, %v1979_v30  ;;  %v1711_v30 = vld [vmem:[%s2259_s4 + $0xa8] sm:$0xff]  }
 0x1c6   : > { %1590 = vmatprep.mubr.msk.bf16.mxu1 %vm1812_vm1, %v1811_v6  ;;  %1559 = vmatpush3.bf16.msra.mxu0 %v1711_v30 }
 0x1c7   : > { %1560 = vmatprep.subr.bf16.mxu0 %v1811_v6  ;;  %1575 = vmatpush3.bf16.msra.mxu1 %v1713_v44 }
 0x1c8   : > { %1576 = vmatprep.subr.bf16.mxu1 %v1811_v6 }
 0x1ca   : > { %1561 = vmatpush3.bf16.msra.mxu0 %v1712_v41 }
 0x1cb   : > { %1562 = vmatprep.subr.bf16.mxu0 %v1811_v6  ;;  %1577 = vmatpush3.bf16.msra.mxu1 %v1715_v46 }
 0x1cc   : > { %1578 = vmatprep.subr.bf16.mxu1 %v1811_v6 }
 0x1ce   : > { %1563 = vmatpush3.bf16.msra.mxu0 %v1714_v45 }
 0x1cf   : > { %1564 = vmatprep.subr.bf16.mxu0 %v1811_v6  ;;  %1579 = vmatpush3.bf16.msra.mxu1 %v1717_v48 }
 0x1d0   : > { %1580 = vmatprep.subr.bf16.mxu1 %v1811_v6 }
 0x1d2   : > { %1565 = vmatpush3.bf16.msra.mxu0 %v1716_v47 }
 0x1d3   : > { %1566 = vmatprep.subr.bf16.mxu0 %v1811_v6  ;;  %1581 = vmatpush3.bf16.msra.mxu1 %v1719_v50 }
 0x1d4   : > { %1582 = vmatprep.subr.bf16.mxu1 %v1811_v6 }
 0x1d6   : > { %1567 = vmatpush3.bf16.msra.mxu0 %v1718_v49 }
 0x1d7   : > { %1568 = vmatprep.subr.bf16.mxu0 %v1811_v6  ;;  %1583 = vmatpush3.bf16.msra.mxu1 %v1721_v54 }
 0x1d8   : > { %1584 = vmatprep.subr.bf16.mxu1 %v1811_v6 }
 0x1da   : > { %1569 = vmatpush3.bf16.msra.mxu0 %v1720_v51 }
 0x1db   : > { %1585 = vmatpush3.bf16.msra.mxu1 %v1722_v55 }
 0x1dc   : > { %1586 = vmatprep.subr.bf16.mxu1 %v1811_v6 }
 0x1df   : > { %1587 = vmatpush3.bf16.msra.mxu1 %v1723_v57 }
 0x1e0   : > { %1588 = vmatprep.subr.bf16.mxu1 %v1811_v6 }
 0x1e3   : > { %1589 = vmatpush3.bf16.msra.mxu1 %v1724_v58 }
 0x208   : > { %v331_v40 = vpop.xlane.xlu0 %330 }
 0x209   : > { %v332_v42 = vsub.f32 %v2082_v60, %v331_v40 }
 0x20b   : > { %v333_v43 = vmul.f32 1.442695, %v332_v42 }
 0x20d   : > { %1735 = vpow2.f32 %v333_v43 }
 0x21a   : > { %v1736_v52 = vpop.eup %1735 }
 0x21b   : > { %v335_v53 = vsel %vm328_vm4, %v1736_v52, 0.0 }
 0x21c   : > { %336 = vadd.xlane.f32.xlu1 %v335_v53  ;;  %v1814_v53 = vmov 1  }
 0x21d   : > { %1641 = vset.pattern.permute.xlu1 %v1814_v53 }
 0x264   : > { %v2204_v59 = vpop.f32.mrf.mxu0 }
 0x266   : > { %v1532_v60 = vpop.f32.mrf.mxu0 }
 0x268   : > { %v577_v61 = vpop.f32.mrf.mxu0 }
 0x269   : > { %v1817_v61 = vmov 3  }
 0x26a   : > { %v1533_v62 = vpop.f32.mrf.mxu0 }
 0x274   : > { %v880_v63 = vpop.f32.mrf.mxu0 }
 0x275   : > { %v2206_v1 = vpop.f32.mrf.mxu1  ;;  %v1379_v2 = vmul.f32 -1.442695, %v880_v63 }
 0x276   : > { %v882_v3 = vpop.f32.mrf.mxu0 }
 0x277   : > { %1737 = vpow2.f32 %v1379_v2  ;;  %v1552_v4 = vpop.f32.mrf.mxu1 }
 0x278   : > { %v884_v5 = vpop.f32.mrf.mxu0 }
 0x279   : > { %v788_v7 = vpop.f32.mrf.mxu1 }
 0x27a   : > { %v885_v8 = vpop.f32.mrf.mxu0 }
 0x27b   : > { %v1553_v9 = vpop.f32.mrf.mxu1 }
 0x284   : > { %v1738_v10 = vpop.eup %1737 }
 0x285   : > { %v890_v11 = vadd.f32 1.0, %v1738_v10  ;;  %v1090_v12 = vpop.f32.mrf.mxu1 }
 0x286   : > { %v1421_v13 = vmul.f32 -1.442695, %v1090_v12 }
 0x287   : > { %1739 = vrcp.f32 %v890_v11  ;;  %v1092_v14 = vpop.f32.mrf.mxu1 }
 0x288   : > { %1741 = vpow2.f32 %v1421_v13 }
 0x289   : > { %v1094_v15 = vpop.f32.mrf.mxu1 }
 0x28b   : > { %v1095_v16 = vpop.f32.mrf.mxu1 }
 0x294   : > { %v1740_v17 = vpop.eup %1739 }
 0x295   : > { %v1742_v18 = vpop.eup %1741  ;;  %v893_v19 = vmul.f32 %v1740_v17, %v880_v63 }
 0x296   : > { %v1100_v20 = vadd.f32 1.0, %v1742_v18 }
 0x297   : > { %v894_v22 = vmul.f32 %v893_v19, %v882_v3 }
 0x298   : > { %1743 = vrcp.f32 %v1100_v20 }
 0x299   : > { %v895_v23 = vpack.c.bf16 %v894_v22, %v894_v22 }
 0x29b   : > { %1571 = vmatmul.mubr.bf16.vlgmr.msra.gmra.mxu0 %v895_v23 }
 0x2a5   : > { %v1744_v24 = vpop.eup %1743  ;;  %v337_v25 = vpop.xlane.xlu1 %336 }
 0x2a6   : > { %v1103_v26 = vmul.f32 %v1744_v24, %v1090_v12  ;;  %1745 = vrcp.f32 %v337_v25 }
 0x2a8   : > { %v1104_v27 = vmul.f32 %v1103_v26, %v1092_v14 }
 0x2aa   : > { %v1105_v28 = vpack.c.bf16 %v1104_v27, %v1104_v27 }
 0x2ac   : > { %1591 = vmatmul.mubr.bf16.vlgmr.msra.gmra.mxu1 %v1105_v28 }
 0x2b3   : > { %v1746_v29 = vpop.eup %1745 }
 0x2b4   : > { %v339_v31 = vmul.f32 %v1746_v29, %v1736_v52 }
 0x2b6   : > { %v340_v32 = vsel %vm328_vm4, %v339_v31, -inf  ;;  %v361_v21 = vmul.f32 %v360_v34, %v339_v31 }
 0x2b7   : > { %341 = vmax.xlane.f32.xlu1 %v340_v32 }
 0x2b8   : > { %v362_v38 = vsel %vm328_vm4, %v361_v21, 0.0 }
 0x340   : > { %v342_v35 = vpop.xlane.xlu1 %341 }
 0x341   : > { %vm343_vm6 = vcmp.ge.f32.partialorder %v339_v31, %v342_v35 }
 0x342   : > { %v344_v36 = vsel %vm343_vm6, -inf, %v339_v31 }
 0x343   : > { %v345_v37 = vsel %vm328_vm4, %v344_v36, -inf }
 0x344   : > { %346 = vmax.xlane.f32.xlu0 %v345_v37 }
 0x348   : > { %363 = vadd.xlane.f32.xlu0 %v362_v38 }
 0x35b   : > { %v995_v39 = vpop.f32.mrf.mxu0 }
 0x35d   : > { %v1572_v30 = vpop.f32.mrf.mxu0 }
 0x35f   : > { %v998_v40 = vpop.f32.mrf.mxu0 }
 0x361   : > { %v1573_v41 = vpop.f32.mrf.mxu0 }
 0x36c   : > { %v1205_v42 = vpop.f32.mrf.mxu1 }
 0x36e   : > { %v1592_v56 = vpop.f32.mrf.mxu1 }
 0x370   : > { %v1208_v43 = vpop.f32.mrf.mxu1 }
 0x372   : > { %v1593_v44 = vpop.f32.mrf.mxu1 }
 0x3cd   : > { %v347_v45 = vpop.xlane.xlu0 %346 }
 0x3ce   : > { %vm348_vm7 = vcmp.ge.f32.partialorder %v344_v36, %v347_v45 }
 0x3cf   : > { %vm349_vm8 = vmor %vm343_vm6, %vm348_vm7 }
 0x3d0   : > { %v1300_v46 = vsel %vm349_vm8, 1.0, %v1811_v6  ;;  %v1816_v6 = vmov 2  }
 0x3d1   : > { %v355_v47 = vmul.f32 %v1300_v46, %v339_v31  ;;  %v364_v50 = vpop.xlane.xlu0 %363 }
 0x3d3   : > { %v356_v48 = vmul.f32 %v1301_v33, %v355_v47 }
 0x3d5   : > { %v357_v49 = vsel %vm328_vm4, %v356_v48, 0.0 }
 0x3d6   : > { %358 = vadd.xlane.f32.xlu1 %v357_v49 }
 0x45f   : > { %v359_v51 = vpop.xlane.xlu1 %358 }
 0x460   : > { %v365_v52 = vadd.f32 %v364_v50, %v359_v51 }
 0x462   : > { %1747 = vrcp.f32 %v365_v52 }
 0x46f   : > { %v1748_v54 = vpop.eup %1747 }
 0x470   : > { %v367_v55 = vmul.f32 %v1748_v54, %v339_v31 }
 0x472   : > { %v368_v57 = vmul.f32 %v1300_v46, %v367_v55 }
 0x474   : > { %370 = vrot.lane.b32.xlu1 %v368_v57, %s1815_s12 }
 0x4e6   : > { %v371_v58 = vpop.permute.xlu1 %370 }
 0x4e7   : > { %v373_v60 = vadd.f32 %v371_v58, %v368_v57 }
 0x4e9   : > { %792 = vperm.xlu1 %1641, %v373_v60   ;;  %582 = vperm.xlu0 %1640, %v373_v60  }
 0x4ed   : > { %1642 = vset.pattern.permute.xlu1 %v1816_v6  ;;  %1644 = vset.pattern.permute.xlu0 %v1817_v61 }
 0x4ee   : > { %1002 = vperm.xlu1 %1642, %v373_v60  }
 0x4f2   : > { %1643 = vset.pattern.permute.xlu1 %v1817_v61 }
 0x4f3   : > { %1212 = vperm.xlu1 %1643, %v373_v60  }
 0x564   : > { %v793_v62 = vpop.permute.xlu1 %792  ;;  %v583_v63 = vpop.permute.xlu0 %582 }
 0x565   : > { %v795_v2 = vmul.f32 %v793_v62, %v2206_v1  ;;  %v585_v3 = vmul.f32 %v583_v63, %v2204_v59 }
 0x567   : > { %v796_v7 = vadd.f32 %v795_v2, %v585_v3 }
 0x569   : > { %v1003_v4 = vpop.permute.xlu1 %1002 }
 0x56a   : > { %v1005_v5 = vmul.f32 %v1003_v4, %v995_v39 }
 0x56c   : > { %v1006_v9 = vadd.f32 %v1005_v5, %v796_v7 }
 0x56e   : > { %v1213_v8 = vpop.permute.xlu1 %1212 }
 0x56f   : > { %v1215_v10 = vmul.f32 %v1213_v8, %v1205_v42 }
 0x571   : > { %v1216_v11 = vadd.f32 %v1215_v10, %v1006_v9 }
 0x573   : > { %v1217_v12 = vadd.f32 %v1216_v11, %v1902_v0 }
 0x575   : > { %1218 = vst.msk [vmem:[%s215_s16] sm:$0xff] %vm223_vm0, %v1217_v12 }
 0x576   : > { %1762 = shalt.err (!%p1759_p3)
}
 0x577   : > { %s1763_s9 = scalar_lea.hbm %s1231_s26, 128  ;;  %s1767_s12 = scalar_lea.hbm %s2260_s5, 256 }
 0x578   : > { %p1764_p4 = scmp.ne.s32.totalorder %s1231_s26, %s1763_s9  ;;  %p1768_p9 = scmp.lt.s32.totalorder %s1231_s26, %s2260_s5 }
 0x579   : > { %p1769_p10 = scmp.lt.s32.totalorder %s1767_s12, %s1763_s9 }
 0x57a   : > { %p1765_p7 = pnand %p1764_p4, %p1887_p5 }
 0x57b   : > { %p1770_p11 = por %p1769_p10, %p1768_p9 }
 0x57c   : > { %p1766_p8 = pneg %p1765_p7 }
 0x57e   : > { %p1771_p12 = pnand %p1770_p11, %p1766_p8 }
 0x580   : > { %1774 = shalt.err (!%p1771_p12)
}
 0x581   : > { %1594 = dma.vmem_to_hbm [thread:$0]  (%p1887_p5), %s1234_s17, 128, %s1231_s26, %s1220_s30  }
 0x582 PF: > { %p1600_p13 = scmp.ge.s32.totalorder %s1809_s21, 2  ;;  %s1245_s15 = sand.u32 1, %s1797_s18  }
 0x583   : > { %s1246_s16 = scalar_lea.sflag [#allocation3], %s1245_s15 }
 0x584   : > { %p1597_p0 = pnand %p1600_p13, %p1891_p6 }
 0x586   : > { %p1598_p1 = pneg %p1597_p0 }
 0x588   : > { %1792 = dma.done.wait (%p1598_p1), %s1246_s16, 128  }
 0x589   : > { %1794 = vsyncadd (%p1598_p1), %s1246_s16, 4294967168  ;;  %p15_p2 = scmp.ge.s32.totalorder %s1874_s24, 4   ;;  %s2263_s18 = smov %s1801_s19 }
 0x58a   : > { %s2264_s19 = smov %s1805_s20  ;;  %s2265_s20 = smov %s1885_s27 }
 0x58b   : > { %s2266_s21 = smov %s1874_s24  ;;  %17 = sbr.rel (!%p15_p2) target bundleno = 3 (0x3), region = 81 }
 0x590   :  { %1251 = vsyncpa [#allocation3], 1 }
 0x591   :  { %1253 = vsyncpa [#allocation3 + $0x1], 1 }

</bundles_post_ra>
